<compile_context>
chip_gen: v6e
topology: v6e:2x2x1
jax: 0.10.0
libtpu: 0.0.40
codegen_flags: <defaults>
</compile_context>

<pallas_src>
import functools
import math

import jax
import jax.numpy as jnp
import numpy as np
from jax import lax
from jax.experimental import pallas as pl
from jax.experimental.pallas import tpu as pltpu


# -------------------------------- the kernel --------------------------------

def self_attention_kernel(x_ref, wqkv_ref, bqkv_ref, wo_ref, bo_ref, out_ref,
                          qkv_scr, ctx_scr, *, channels, num_heads, scale):
    C = channels
    hs = C // num_heads
    xT = x_ref[0]                                   # (C, S), compute dtype, S on lanes
    cdt = xT.dtype

    # Fused QKV projection in the transposed layout: qkv^T = W_qkv @ x^T + b -> (3C, S)
    qkvT = jnp.dot(wqkv_ref[...], xT, preferred_element_type=jnp.float32)
    qkv_scr[...] = qkvT + bqkv_ref[...]             # f32, bias broadcasts over lanes

    def head_body(h, carry):
        off_q = pl.multiple_of(h * hs, hs)
        off_k = pl.multiple_of(C + h * hs, hs)
        off_v = pl.multiple_of(2 * C + h * hs, hs)

        # 1/sqrt(hs) folded into the small (hs, S) q slice, not the (S, S) scores.
        qT = (qkv_scr[pl.ds(off_q, hs), :] * scale).astype(cdt)   # (hs, S)
        kT = qkv_scr[pl.ds(off_k, hs), :].astype(cdt)             # (hs, S)
        vT = qkv_scr[pl.ds(off_v, hs), :].astype(cdt)             # (hs, S)

        # scores^T: keys on sublanes, queries on lanes; head dim contracted directly
        # (no explicit transpose anywhere).
        sT = lax.dot_general(kT, qT, (((0,), (0,)), ((), ())),
                             preferred_element_type=jnp.float32)  # (S_k, S_q) f32

        # Numerically stable softmax over keys (sublane axis), kept in f32.
        # Normalization is deferred past the p @ v matmul.
        m = jnp.max(sT, axis=0, keepdims=True)                    # (1, S_q)
        pT = jnp.exp(sT - m)                                      # (S_k, S_q) f32
        l = jnp.sum(pT, axis=0, keepdims=True)                    # (1, S_q)

        # ctx^T = v^T @ p^T  -> (hs, S_q); scale columns by 1/l (EUP reciprocal).
        ctxT = lax.dot_general(vT, pT.astype(cdt), (((1,), (0,)), ((), ())),
                               preferred_element_type=jnp.float32)
        ctx_scr[pl.ds(off_q, hs), :] = ctxT * pl.reciprocal(l, approx=True)
        return carry

    # fori_loop (not a static unroll) bounds the live range of the per-head (S, S)
    # intermediates to a single head.
    lax.fori_loop(0, num_heads, head_body, 0)

    # Output projection: out^T = W_o @ ctx^T + b_o -> (C, S); lane-dense store.
    outT = jnp.dot(wo_ref[...], ctx_scr[...].astype(cdt),
                   preferred_element_type=jnp.float32)
    out_ref[0] = (outT + bo_ref[...]).astype(out_ref.dtype)


# ------------------------------- JAX wrapper --------------------------------

def self_attention_forward(x_nchw, params, *, num_heads,
                           compute_dtype=jnp.bfloat16):
    B, C, H, W = x_nchw.shape
    assert C % num_heads == 0
    S = H * W
    hs = C // num_heads
    scale = 1.0 / math.sqrt(hs)

    # NCHW -> (B, C, S): a FREE reshape (no transpose).  Channels/heads land on
    # sublanes, the S = H*W sequence lands on lanes (lane-dense everywhere).
    x_cs = x_nchw.reshape(B, C, S).astype(compute_dtype)

    # torch Linear weights are (out, in) -- exactly what out^T = W @ x^T wants,
    # so weights are used as-is (no transpose).  Biases become f32 columns.
    wqkv = params["w_qkv"].astype(compute_dtype)                   # (3C, C)
    bqkv = params["b_qkv"].reshape(3 * C, 1).astype(jnp.float32)   # (3C, 1)
    wo = params["w_o"].astype(compute_dtype)                       # (C, C)
    bo = params["b_o"].reshape(C, 1).astype(jnp.float32)           # (C, 1)

    kernel = functools.partial(self_attention_kernel,
                               channels=C, num_heads=num_heads, scale=scale)

    def full(shape):
        return pl.BlockSpec(shape, lambda b: (0,) * len(shape))

    # TODO(synk): when B is large, block (Bt, C, S) with Bt > 1 to amortize the
    #             ~0.35 us/step overhead; keep >= 2 grid steps for v7x megacore.
    out_cs = pl.pallas_call(
        kernel,
        out_shape=jax.ShapeDtypeStruct((B, C, S), jnp.float32),
        grid=(B,),
        in_specs=[
            pl.BlockSpec((1, C, S), lambda b: (b, 0, 0)),
            full((3 * C, C)),
            full((3 * C, 1)),
            full((C, C)),
            full((C, 1)),
        ],
        out_specs=pl.BlockSpec((1, C, S), lambda b: (b, 0, 0)),
        scratch_shapes=[
            pltpu.VMEM((3 * C, S), jnp.float32),   # qkv^T (f32 accumulation)
            pltpu.VMEM((C, S), jnp.float32),       # concatenated ctx^T
        ],
        compiler_params=pltpu.CompilerParams(dimension_semantics=("parallel",)),
    )(x_cs, wqkv, bqkv, wo, bo)

    # (B, C, S) -> (B, C, H, W): also a free reshape.
    return out_cs.reshape(B, C, H, W)


# ------------------------- pure-JAX reference (check) ------------------------

def reference_forward(x, params, num_heads):
    B, C, H, W = x.shape
    hs = C // num_heads
    xr = jnp.transpose(x, (0, 2, 3, 1)).reshape(B, H * W, C)
    qkv = xr @ params["w_qkv"].T + params["b_qkv"]
    q, k, v = qkv[..., :C], qkv[..., C:2 * C], qkv[..., 2 * C:]

    def split_heads(t):
        return jnp.transpose(t.reshape(B, H * W, num_heads, hs), (0, 2, 1, 3))

    qh, kh, vh = split_heads(q), split_heads(k), split_heads(v)
    scores = jnp.einsum('bhqd,bhkd->bhqk', qh, kh) / np.sqrt(hs)
    probs = jax.nn.softmax(scores, axis=-1)
    ctx = jnp.einsum('bhqk,bhkd->bhqd', probs, vh)
    ctx = jnp.transpose(ctx, (0, 2, 1, 3)).reshape(B, H * W, C)
    out = ctx @ params["w_o"].T + params["b_o"]
    return jnp.transpose(out.reshape(B, H, W, C), (0, 3, 1, 2))


# ----------------------------------- main ------------------------------------

if __name__ == "__main__":
    B, C, H, W, num_heads = 2, 32, 16, 16, 4

    key = jax.random.PRNGKey(0)
    kx, k1, k2, k3, k4 = jax.random.split(key, 5)
    bound = 1.0 / math.sqrt(C)
    x = jax.random.normal(kx, (B, C, H, W), jnp.float32)
    params = {
        "w_qkv": jax.random.uniform(k1, (3 * C, C), jnp.float32, -bound, bound),
        "b_qkv": jax.random.uniform(k2, (3 * C,), jnp.float32, -bound, bound),
        "w_o": jax.random.uniform(k3, (C, C), jnp.float32, -bound, bound),
        "b_o": jax.random.uniform(k4, (C,), jnp.float32, -bound, bound),
    }

    ref = reference_forward(x, params, num_heads)

    # f32 path (tight check against the pure-JAX reference; slack only for the
    # approximate EUP reciprocal used in the deferred normalization)
    out_f32 = self_attention_forward(x, params, num_heads=num_heads,
                                     compute_dtype=jnp.float32)
    out_f32 = jax.block_until_ready(out_f32)
    np.testing.assert_allclose(np.asarray(out_f32), np.asarray(ref),
                               rtol=2e-3, atol=2e-3)

    # default bf16 MXU path (f32 accumulation + f32 softmax), looser tolerance
    out_bf16 = self_attention_forward(x, params, num_heads=num_heads)
    out_bf16 = jax.block_until_ready(out_bf16)
    np.testing.assert_allclose(np.asarray(out_bf16), np.asarray(ref),
                               rtol=5e-2, atol=5e-2)

    print("KERNEL_OK")
</pallas_src>

<mosaic_0001>
module attributes {stable_mosaic.version = 11 : i64} {
  func.func @self_attention_kernel(%arg0: i32, %arg1: memref<1x32x256xf32, #tpu.memory_space<vmem>>, %arg2: memref<96x32xf32, #tpu.memory_space<vmem>>, %arg3: memref<96x1xf32, #tpu.memory_space<vmem>>, %arg4: memref<32x32xf32, #tpu.memory_space<vmem>>, %arg5: memref<32x1xf32, #tpu.memory_space<vmem>>, %arg6: memref<1x32x256xf32, #tpu.memory_space<vmem>>, %arg7: memref<96x256xf32, #tpu.memory_space<vmem>>, %arg8: memref<32x256xf32, #tpu.memory_space<vmem>>) attributes {dimension_semantics = [#tpu.dimension_semantics<parallel>], iteration_bounds = array<i64: 2>, scalar_prefetch = 0 : i64, scratch_operands = 2 : i64, tpu.core_type = #tpu.core_type<tc>, window_params = [{transform_indices = @transform_0, window_bounds = array<i64: 1, 32, 256>}, {pipeline_mode = #tpu.pipeline_mode<synchronous>, transform_indices = @transform_1, window_bounds = array<i64: 96, 32>}, {pipeline_mode = #tpu.pipeline_mode<synchronous>, transform_indices = @transform_2, window_bounds = array<i64: 96, 1>}, {pipeline_mode = #tpu.pipeline_mode<synchronous>, transform_indices = @transform_3, window_bounds = array<i64: 32, 32>}, {pipeline_mode = #tpu.pipeline_mode<synchronous>, transform_indices = @transform_4, window_bounds = array<i64: 32, 1>}, {transform_indices = @transform_5, window_bounds = array<i64: 1, 32, 256>}]} {
    %c0 = arith.constant 0 : index
    %c0_0 = arith.constant 0 : index
    %c0_1 = arith.constant 0 : index
    %0 = vector.load %arg1[%c0, %c0_0, %c0_1] : memref<1x32x256xf32, #tpu.memory_space<vmem>>, vector<1x32x256xf32>
    %1 = vector.shape_cast %0 : vector<1x32x256xf32> to vector<32x256xf32>
    %c0_2 = arith.constant 0 : index
    %c0_3 = arith.constant 0 : index
    %2 = vector.load %arg2[%c0_2, %c0_3] : memref<96x32xf32, #tpu.memory_space<vmem>>, vector<96x32xf32>
    %cst = arith.constant dense<0.000000e+00> : vector<96x256xf32>
    %3 = tpu.matmul %2, %1, %cst {dimension_numbers = #tpu.dot_dimension_numbers<[1], [0], [0], [1], [0, 0, 1, 1], [], []>} : vector<96x32xf32>, vector<32x256xf32>, vector<96x256xf32> -> vector<96x256xf32>
    %c0_4 = arith.constant 0 : index
    %c0_5 = arith.constant 0 : index
    %4 = vector.load %arg3[%c0_4, %c0_5] : memref<96x1xf32, #tpu.memory_space<vmem>>, vector<96x1xf32>
    %5 = vector.broadcast %4 : vector<96x1xf32> to vector<96x256xf32>
    %6 = arith.addf %3, %5 : vector<96x256xf32>
    %c0_6 = arith.constant 0 : index
    %c0_7 = arith.constant 0 : index
    %7 = vector.load %arg7[%c0_6, %c0_7] : memref<96x256xf32, #tpu.memory_space<vmem>>, vector<96x256xf32>
    tpu.vector_store %arg7[%c0_6, %c0_7], %6 {strides = array<i32>} : memref<96x256xf32, #tpu.memory_space<vmem>>, vector<96x256xf32>,
    %c0_i32 = arith.constant 0 : i32
    %c4_i32 = arith.constant 4 : i32
    %8 = arith.addi %c0_i32, %c4_i32 : i32
    %c1_i32 = arith.constant 1 : i32
    scf.for %arg9 = %c0_i32 to %8 step %c1_i32  : i32 {
      %c8_i32 = arith.constant 8 : i32
      %18 = arith.muli %arg9, %c8_i32 : i32
      %19 = tpu.assume_multiple %18, 8 : i32
      %c8_i32_19 = arith.constant 8 : i32
      %20 = arith.muli %arg9, %c8_i32_19 : i32
      %c32_i32 = arith.constant 32 : i32
      %21 = arith.addi %c32_i32, %20 : i32
      %22 = tpu.assume_multiple %21, 8 : i32
      %c8_i32_20 = arith.constant 8 : i32
      %23 = arith.muli %arg9, %c8_i32_20 : i32
      %c64_i32 = arith.constant 64 : i32
      %24 = arith.addi %c64_i32, %23 : i32
      %25 = tpu.assume_multiple %24, 8 : i32
      %26 = arith.index_cast %19 : i32 to index
      %c0_21 = arith.constant 0 : index
      %27 = vector.load %arg7[%26, %c0_21] : memref<96x256xf32, #tpu.memory_space<vmem>>, vector<8x256xf32>
      %cst_22 = arith.constant 0.353553385 : f32
      %28 = vector.broadcast %cst_22 : f32 to vector<8x256xf32>
      %29 = arith.mulf %27, %28 : vector<8x256xf32>
      %30 = arith.index_cast %22 : i32 to index
      %c0_23 = arith.constant 0 : index
      %31 = vector.load %arg7[%30, %c0_23] : memref<96x256xf32, #tpu.memory_space<vmem>>, vector<8x256xf32>
      %32 = arith.index_cast %25 : i32 to index
      %c0_24 = arith.constant 0 : index
      %33 = vector.load %arg7[%32, %c0_24] : memref<96x256xf32, #tpu.memory_space<vmem>>, vector<8x256xf32>
      %cst_25 = arith.constant dense<0.000000e+00> : vector<256x256xf32>
      %34 = tpu.matmul %31, %29, %cst_25 {dimension_numbers = #tpu.dot_dimension_numbers<[0], [0], [1], [1], [0, 1, 1, 1], [], []>} : vector<8x256xf32>, vector<8x256xf32>, vector<256x256xf32> -> vector<256x256xf32>
      %cst_26 = arith.constant dense<0xFF800000> : vector<256xf32>
      %35 = vector.multi_reduction <maximumf>, %34, %cst_26 [0] : vector<256x256xf32> to vector<256xf32>
      %36 = vector.shape_cast %35 : vector<256xf32> to vector<1x256xf32>
      %37 = vector.broadcast %36 : vector<1x256xf32> to vector<256x256xf32>
      %38 = arith.subf %34, %37 : vector<256x256xf32>
      %39 = math.exp %38 : vector<256x256xf32>
      %cst_27 = arith.constant dense<0.000000e+00> : vector<256xf32>
      %40 = vector.multi_reduction <add>, %39, %cst_27 [0] : vector<256x256xf32> to vector<256xf32>
      %41 = vector.shape_cast %40 : vector<256xf32> to vector<1x256xf32>
      %cst_28 = arith.constant dense<0.000000e+00> : vector<8x256xf32>
      %42 = tpu.matmul %33, %39, %cst_28 {dimension_numbers = #tpu.dot_dimension_numbers<[1], [0], [0], [1], [0, 0, 1, 1], [], []>} : vector<8x256xf32>, vector<256x256xf32>, vector<8x256xf32> -> vector<8x256xf32>
      %43 = tpu.reciprocal %41 {approx = true} : vector<1x256xf32> -> vector<1x256xf32>
      %44 = vector.broadcast %43 : vector<1x256xf32> to vector<8x256xf32>
      %45 = arith.mulf %42, %44 : vector<8x256xf32>
      %46 = arith.index_cast %19 : i32 to index
      %c0_29 = arith.constant 0 : index
      %47 = vector.load %arg8[%46, %c0_29] : memref<32x256xf32, #tpu.memory_space<vmem>>, vector<8x256xf32>
      tpu.vector_store %arg8[%46, %c0_29], %45 {strides = array<i32>} : memref<32x256xf32, #tpu.memory_space<vmem>>, vector<8x256xf32>,
    }
    %c4_i32_8 = arith.constant 4 : i32
    %c0_9 = arith.constant 0 : index
    %c0_10 = arith.constant 0 : index
    %9 = vector.load %arg4[%c0_9, %c0_10] : memref<32x32xf32, #tpu.memory_space<vmem>>, vector<32x32xf32>
    %c0_11 = arith.constant 0 : index
    %c0_12 = arith.constant 0 : index
    %10 = vector.load %arg8[%c0_11, %c0_12] : memref<32x256xf32, #tpu.memory_space<vmem>>, vector<32x256xf32>
    %cst_13 = arith.constant dense<0.000000e+00> : vector<32x256xf32>
    %11 = tpu.matmul %9, %10, %cst_13 {dimension_numbers = #tpu.dot_dimension_numbers<[1], [0], [0], [1], [0, 0, 1, 1], [], []>} : vector<32x32xf32>, vector<32x256xf32>, vector<32x256xf32> -> vector<32x256xf32>
    %c0_14 = arith.constant 0 : index
    %c0_15 = arith.constant 0 : index
    %12 = vector.load %arg5[%c0_14, %c0_15] : memref<32x1xf32, #tpu.memory_space<vmem>>, vector<32x1xf32>
    %13 = vector.broadcast %12 : vector<32x1xf32> to vector<32x256xf32>
    %14 = arith.addf %11, %13 : vector<32x256xf32>
    %c0_16 = arith.constant 0 : index
    %c0_17 = arith.constant 0 : index
    %c0_18 = arith.constant 0 : index
    %15 = vector.load %arg6[%c0_16, %c0_17, %c0_18] : memref<1x32x256xf32, #tpu.memory_space<vmem>>, vector<1x32x256xf32>
    %16 = vector.shape_cast %15 : vector<1x32x256xf32> to vector<32x256xf32>
    %17 = vector.shape_cast %14 : vector<32x256xf32> to vector<1x32x256xf32>
    tpu.vector_store %arg6[%c0_16, %c0_17, %c0_18], %17 {strides = array<i32>} : memref<1x32x256xf32, #tpu.memory_space<vmem>>, vector<1x32x256xf32>,
    return
  }
  func.func @transform_0(%arg0: i32) -> (i32, i32, i32) {
    %c0_i32 = arith.constant 0 : i32
    %c0_i32_0 = arith.constant 0 : i32
    %c0_i32_1 = arith.constant 0 : i32
    return %arg0, %c0_i32, %c0_i32_0 : i32, i32, i32
  }
  func.func @transform_1(%arg0: i32) -> (i32, i32) {
    %c0_i32 = arith.constant 0 : i32
    %c0_i32_0 = arith.constant 0 : i32
    %c0_i32_1 = arith.constant 0 : i32
    return %c0_i32, %c0_i32_0 : i32, i32
  }
  func.func @transform_2(%arg0: i32) -> (i32, i32) {
    %c0_i32 = arith.constant 0 : i32
    %c0_i32_0 = arith.constant 0 : i32
    %c0_i32_1 = arith.constant 0 : i32
    return %c0_i32, %c0_i32_0 : i32, i32
  }
  func.func @transform_3(%arg0: i32) -> (i32, i32) {
    %c0_i32 = arith.constant 0 : i32
    %c0_i32_0 = arith.constant 0 : i32
    %c0_i32_1 = arith.constant 0 : i32
    return %c0_i32, %c0_i32_0 : i32, i32
  }
  func.func @transform_4(%arg0: i32) -> (i32, i32) {
    %c0_i32 = arith.constant 0 : i32
    %c0_i32_0 = arith.constant 0 : i32
    %c0_i32_1 = arith.constant 0 : i32
    return %c0_i32, %c0_i32_0 : i32, i32
  }
  func.func @transform_5(%arg0: i32) -> (i32, i32, i32) {
    %c0_i32 = arith.constant 0 : i32
    %c0_i32_0 = arith.constant 0 : i32
    %c0_i32_1 = arith.constant 0 : i32
    return %arg0, %c0_i32, %c0_i32_0 : i32, i32, i32
  }
}

</mosaic_0001>

<bundles_post_ra>
// kernel: tpu_custom_call.1
= control target key start
LH: loop header
LB: loop body
LE: loop exit
PB: predicated region body
PF: predicated region fallthrough
CT: control target
= control target key end

     0   :  { %10 = vsyncpa [#allocation5], 0  ;;  %s2858_s0 = inlined_call_operand.vmem [shape: f32[2,32,256], index: 0, kind: input, shape index: {}]   ;;  %s2859_s1 = inlined_call_operand.vmem [shape: f32[96,32], index: 1, kind: input, shape index: {}]   ;;  %s2860_s2 = inlined_call_operand.vmem [shape: f32[96,1], index: 2, kind: input, shape index: {}]   ;;  %s2861_s3 = inlined_call_operand.vmem [shape: f32[32,32], index: 3, kind: input, shape index: {}]   ;;  %s2862_s4 = inlined_call_operand.vmem [shape: f32[32,1], index: 4, kind: input, shape index: {}]   ;;  %s2863_s5 = inlined_call_operand.hbm [shape: f32[2,32,256], index: 5, kind: output, shape index: {}]  }
   0x1   :  { %12 = vsyncpa [#allocation5 + $0x1], 0  ;;  %s2000_s18 = smov 0   ;;  %s2002_s19 = smov 0  }
   0x2   :  { %s2004_s20 = smov 0   ;;  %s2006_s21 = smov 0  }
   0x3 LB: > { %s2021_s22 = sadd.s32 4294967295, %s1958_s21   ;;  %s1616_s23 = sadd.s32 4294967294, %s1958_s21   ;;  %s1958_s21 = sphi %s2006_s21, %s2935_s21   ;;  %s1954_s20 = sphi %s2004_s20, %s2934_s20   ;;  %s1950_s19 = sphi %s2002_s19, %s2933_s19   ;;  %s1946_s18 = sphi %s2000_s18, %s2932_s18  }
   0x4   : > { %s2025_s24 = sadd.s32 1, %s1958_s21   ;;  %s135_s25 = sadd.s32 1, %s1954_s20 }
   0x5   : > { %s132_s26 = ssub.s32 %s1958_s21, %s2025_s24  ;;  %p145_p0 = scmp.ne.s32.totalorder %s1954_s20, %s1950_s19 }
   0x6   : > { %p133_p1 = scmp.eq.s32.totalorder %s132_s26, 0  ;;  %p146_p2 = scmp.eq.s32.totalorder %s2021_s22, 1 }
   0x7   : > { %p151_p3 = scmp.ne.s32.totalorder %s1950_s19, %s1946_s18  ;;  %p152_p4 = scmp.eq.s32.totalorder %s1616_s23, 1 }
   0x8   : > { %s2036_s27 = scalar_select %p133_p1, %s1954_s20, %s135_s25  }
   0x9   : > { %p2038_p5 = por %p146_p2, %p145_p0  ;;  %p2042_p6 = por %p152_p4, %p151_p3 }
   0xa   : > { %p1619_p7 = scmp.ge.s32.totalorder %s1958_s21, 1  ;;  %p190_p8 = scmp.lt.s32.totalorder %s1958_s21, 3 }
   0xc   : > { %p191_p9 = pnand %p1619_p7, %p190_p8 }
   0xd   : > { %s215_s30 = sand.u32 (!%p191_p9), 1, %s1950_s19   ;;  %p218_p10 = scmp.lt.s32.totalorder (!%p191_p9), %s2021_s22, 1 }
   0xe   : > { %194 = sbr.rel (%p191_p9) target bundleno = 1270 (0x4f6), region = 40  ;;  %s2052_s6 = sshll.u32 (!%p191_p9), %s215_s30, 6 }
   0xf   : > { %s2165_s23 = scalar_lea.vmem (!%p191_p9), [#allocation4], %s2052_s6  ;;  %s2167_s25 = smov (!%p191_p9), 0  }
  0x13   : > { %v2866_v0 = vmov 0.0   ;;  %v2864_v1 = vmov 0   ;;  %s219_s7 = scalar_select %p218_p10, %s2021_s22, 1  ;;  %v245_v2 = vld [vmem:[%s2860_s2 + $0x10] sm:$0xff]  ;;  %v243_v3 = vld [vmem:[%s2860_s2] sm:$0xff]  ;;  %vm315_vm0 = vcmask 261120  }
  0x14   : > { %416 = vmatprep.mubr.f32.mxu0 %v2866_v0  ;;  %452 = vmatprep.mubr.f32.mxu1 %v2866_v0  ;;  %v231_v12 = vld [vmem:[%s2859_s1] sm:$0xff]  ;;  %v237_v13 = vld [vmem:[%s2859_s1 + $0x30] sm:$0xff]  ;;  %v246_v14 = vld [vmem:[%s2860_s2 + $0x18] sm:$0xff] }
  0x15   : > { %1759 = vset.pattern.permute.xlu1 %v2864_v1  ;;  %1758 = vset.pattern.permute.xlu0 %v2864_v1  ;;  %s1684_s12 = sshll.u32 %s219_s7, 6  ;;  %v244_v15 = vld [vmem:[%s2860_s2 + $0x8] sm:$0xff]  ;;  %v238_v17 = vld [vmem:[%s2859_s1 + $0x38] sm:$0xff]  ;;  %v247_v19 = vld [vmem:[%s2860_s2 + $0x20] sm:$0xff] }
  0x16   : > { %267 = vperm.xlu1 %1759, %v245_v2   ;;  %257 = vperm.xlu0 %1758, %v243_v3   ;;  %s222_s15 = scalar_lea.vmem %s2858_s0, %s1684_s12  ;;  %v232_v16 = vld [vmem:[%s2859_s1 + $0x8] sm:$0xff]  ;;  %v233_v20 = vld [vmem:[%s2859_s1 + $0x10] sm:$0xff]  ;;  %v239_v21 = vld [vmem:[%s2859_s1 + $0x40] sm:$0xff] }
  0x17   : > { %v230_v4 = vld [vmem:[%s222_s15 + $0x38] sm:$0xff]  ;;  %v229_v5 = vld [vmem:[%s222_s15 + $0x30] sm:$0xff]  ;;  %v228_v6 = vld [vmem:[%s222_s15 + $0x28] sm:$0xff] }
  0x18   : > { %376 = vmatprep.subr.mxu0 %v230_v4  ;;  %1690 = vmatprep.subr.mxu1 %v230_v4  ;;  %v227_v7 = vld [vmem:[%s222_s15 + $0x20] sm:$0xff]  ;;  %v226_v8 = vld [vmem:[%s222_s15 + $0x18] sm:$0xff]  ;;  %v225_v9 = vld [vmem:[%s222_s15 + $0x10] sm:$0xff] }
  0x19   : > { %377 = vmatpush1.msra.mxu0 %v229_v5  ;;  %1694 = vmatpush1.msra.mxu1 %v229_v5  ;;  %v224_v10 = vld [vmem:[%s222_s15 + $0x8] sm:$0xff]  ;;  %v223_v11 = vld [vmem:[%s222_s15] sm:$0xff]  ;;  %v250_v22 = vld [vmem:[%s2860_s2 + $0x38] sm:$0xff] }
  0x1a   : > { %378 = vmatprep.subr.mxu0 %v228_v6  ;;  %1691 = vmatprep.subr.mxu1 %v228_v6  ;;  %v248_v18 = vld [vmem:[%s2860_s2 + $0x28] sm:$0xff]  ;;  %v249_v23 = vld [vmem:[%s2860_s2 + $0x30] sm:$0xff]  ;;  %v234_v24 = vld [vmem:[%s2859_s1 + $0x18] sm:$0xff] }
  0x1b   : > { %379 = vmatpush1.msra.mxu0 %v227_v7  ;;  %1695 = vmatpush1.msra.mxu1 %v227_v7  ;;  %v240_v25 = vld [vmem:[%s2859_s1 + $0x48] sm:$0xff]  ;;  %v251_v27 = vld [vmem:[%s2860_s2 + $0x40] sm:$0xff]  ;;  %v241_v29 = vld [vmem:[%s2859_s1 + $0x50] sm:$0xff] }
  0x1c   : > { %380 = vmatprep.subr.mxu0 %v226_v8  ;;  %1692 = vmatprep.subr.mxu1 %v226_v8  ;;  %v252_v26 = vld [vmem:[%s2860_s2 + $0x48] sm:$0xff]  ;;  %v235_v28 = vld [vmem:[%s2859_s1 + $0x20] sm:$0xff]  ;;  %v254_v30 = vld [vmem:[%s2860_s2 + $0x58] sm:$0xff] }
  0x1d   : > { %381 = vmatpush1.msra.mxu0 %v225_v9  ;;  %1696 = vmatpush1.msra.mxu1 %v225_v9  ;;  %v253_v31 = vld [vmem:[%s2860_s2 + $0x50] sm:$0xff]  ;;  %v236_v32 = vld [vmem:[%s2859_s1 + $0x28] sm:$0xff]  ;;  %v242_v33 = vld [vmem:[%s2859_s1 + $0x58] sm:$0xff] }
  0x1e   : > { %382 = vmatprep.subr.mxu0 %v224_v10  ;;  %1693 = vmatprep.subr.mxu1 %v224_v10 }
  0x1f   : > { %383 = vmatpush1.msra.mxu0 %v223_v11  ;;  %1697 = vmatpush1.msra.mxu1 %v223_v11 }
  0x20   : > { %1623 = vmatmul.mubr.msk.f32.vlgmr.msra.gmra.mxu0 %vm315_vm0, %v231_v12  ;;  %1629 = vmatmul.mubr.msk.f32.vlgmr.msra.gmra.mxu1 %vm315_vm0, %v237_v13 }
  0x21   : > { %422 = vmatprep.mubr.f32.mxu0 %v2866_v0  ;;  %458 = vmatprep.mubr.f32.mxu1 %v2866_v0 }
  0x22   : > { %272 = vperm.xlu1 %1759, %v246_v14   ;;  %262 = vperm.xlu0 %1758, %v244_v15  }
  0x24   : > { %1624 = vmatmul.mubr.msk.f32.gmra.mxu0 %vm315_vm0, %v232_v16  ;;  %1630 = vmatmul.mubr.msk.f32.gmra.mxu1 %vm315_vm0, %v238_v17 }
  0x25   : > { %428 = vmatprep.mubr.f32.mxu0 %v2866_v0  ;;  %464 = vmatprep.mubr.f32.mxu1 %v2866_v0 }
  0x26   : > { %282 = vperm.xlu1 %1759, %v248_v18   ;;  %277 = vperm.xlu0 %1758, %v247_v19  }
  0x28   : > { %1625 = vmatmul.mubr.msk.f32.gmra.mxu0 %vm315_vm0, %v233_v20  ;;  %1631 = vmatmul.mubr.msk.f32.gmra.mxu1 %vm315_vm0, %v239_v21 }
  0x29   : > { %434 = vmatprep.mubr.f32.mxu0 %v2866_v0  ;;  %470 = vmatprep.mubr.f32.mxu1 %v2866_v0 }
  0x2a   : > { %292 = vperm.xlu1 %1759, %v250_v22   ;;  %287 = vperm.xlu0 %1758, %v249_v23  }
  0x2c   : > { %1626 = vmatmul.mubr.msk.f32.gmra.mxu0 %vm315_vm0, %v234_v24  ;;  %1632 = vmatmul.mubr.msk.f32.gmra.mxu1 %vm315_vm0, %v240_v25 }
  0x2d   : > { %440 = vmatprep.mubr.f32.mxu0 %v2866_v0  ;;  %476 = vmatprep.mubr.f32.mxu1 %v2866_v0 }
  0x2e   : > { %302 = vperm.xlu1 %1759, %v252_v26   ;;  %297 = vperm.xlu0 %1758, %v251_v27  }
  0x30   : > { %1627 = vmatmul.mubr.msk.f32.gmra.mxu0 %vm315_vm0, %v235_v28  ;;  %1633 = vmatmul.mubr.msk.f32.gmra.mxu1 %vm315_vm0, %v241_v29 }
  0x31   : > { %446 = vmatprep.mubr.f32.mxu0 %v2866_v0  ;;  %482 = vmatprep.mubr.f32.mxu1 %v2866_v0 }
  0x32   : > { %312 = vperm.xlu1 %1759, %v254_v30   ;;  %307 = vperm.xlu0 %1758, %v253_v31  }
  0x34   : > { %1628 = vmatmul.mubr.msk.f32.gmra.mxu0 %vm315_vm0, %v236_v32  ;;  %1634 = vmatmul.mubr.msk.f32.gmra.mxu1 %vm315_vm0, %v242_v33 }
  0x91   : > { %v258_v34 = vpop.permute.xlu0 %257  ;;  %v268_v35 = vpop.permute.xlu1 %267 }
  0x9d   : > { %v263_v36 = vpop.permute.xlu0 %262  ;;  %v273_v37 = vpop.permute.xlu1 %272 }
  0xa1   : > { %v2156_v38 = vpop.permute.xlu0 %277  ;;  %v2158_v39 = vpop.permute.xlu1 %282 }
  0xa5   : > { %v288_v40 = vpop.permute.xlu0 %287  ;;  %v293_v47 = vpop.permute.xlu1 %292 }
  0xa9   : > { %v298_v56 = vpop.permute.xlu0 %297  ;;  %v303_v3 = vpop.permute.xlu1 %302 }
  0xad   : > { %v308_v12 = vpop.permute.xlu0 %307  ;;  %v313_v21 = vpop.permute.xlu1 %312 }
  0xe0   : > { %v418_v41 = vpop.f32.mrf.mxu0  ;;  %v454_v42 = vpop.f32.mrf.mxu1 }
  0xe1   : > { %v419_v43 = vadd.f32 %v418_v41, %v258_v34  ;;  %v455_v44 = vadd.f32 %v454_v42, %v288_v40 }
  0xe2   : > { %v420_v45 = vpop.f32.mrf.mxu0  ;;  %v456_v46 = vpop.f32.mrf.mxu1 }
  0xe3   : > { %489 = vst [vmem:[#allocation2] sm:$0xff] %v419_v43  ;;  %501 = vst [vmem:[#allocation2 + $0x60] sm:$0xff] %v455_v44  ;;  %v421_v48 = vadd.f32 %v420_v45, %v258_v34  ;;  %v457_v49 = vadd.f32 %v456_v46, %v288_v40 }
  0xe4   : > { %v424_v50 = vpop.f32.mrf.mxu0  ;;  %v460_v51 = vpop.f32.mrf.mxu1 }
  0xe5   : > { %490 = vst [vmem:[#allocation2 + $0x8] sm:$0xff] %v421_v48  ;;  %502 = vst [vmem:[#allocation2 + $0x68] sm:$0xff] %v457_v49  ;;  %v425_v52 = vadd.f32 %v424_v50, %v263_v36  ;;  %v461_v53 = vadd.f32 %v460_v51, %v293_v47 }
  0xe6   : > { %v426_v54 = vpop.f32.mrf.mxu0  ;;  %v462_v55 = vpop.f32.mrf.mxu1 }
  0xe7   : > { %491 = vst [vmem:[#allocation2 + $0x10] sm:$0xff] %v425_v52  ;;  %503 = vst [vmem:[#allocation2 + $0x70] sm:$0xff] %v461_v53  ;;  %v427_v57 = vadd.f32 %v426_v54, %v263_v36  ;;  %v463_v58 = vadd.f32 %v462_v55, %v293_v47 }
  0xe8   : > { %v430_v59 = vpop.f32.mrf.mxu0  ;;  %v466_v60 = vpop.f32.mrf.mxu1 }
  0xe9   : > { %492 = vst [vmem:[#allocation2 + $0x18] sm:$0xff] %v427_v57  ;;  %504 = vst [vmem:[#allocation2 + $0x78] sm:$0xff] %v463_v58  ;;  %v431_v61 = vadd.f32 %v430_v59, %v268_v35  ;;  %v467_v62 = vadd.f32 %v466_v60, %v298_v56 }
  0xea   : > { %v432_v63 = vpop.f32.mrf.mxu0  ;;  %v468_v2 = vpop.f32.mrf.mxu1 }
  0xeb   : > { %493 = vst [vmem:[#allocation2 + $0x20] sm:$0xff] %v431_v61  ;;  %505 = vst [vmem:[#allocation2 + $0x80] sm:$0xff] %v467_v62  ;;  %v433_v4 = vadd.f32 %v432_v63, %v268_v35  ;;  %v469_v5 = vadd.f32 %v468_v2, %v298_v56 }
  0xec   : > { %v436_v6 = vpop.f32.mrf.mxu0  ;;  %v472_v7 = vpop.f32.mrf.mxu1 }
  0xed   : > { %494 = vst [vmem:[#allocation2 + $0x28] sm:$0xff] %v433_v4  ;;  %506 = vst [vmem:[#allocation2 + $0x88] sm:$0xff] %v469_v5  ;;  %v437_v8 = vadd.f32 %v436_v6, %v273_v37  ;;  %v473_v9 = vadd.f32 %v472_v7, %v303_v3 }
  0xee   : > { %v438_v10 = vpop.f32.mrf.mxu0  ;;  %v474_v11 = vpop.f32.mrf.mxu1 }
  0xef   : > { %495 = vst [vmem:[#allocation2 + $0x30] sm:$0xff] %v437_v8  ;;  %507 = vst [vmem:[#allocation2 + $0x90] sm:$0xff] %v473_v9  ;;  %v439_v13 = vadd.f32 %v438_v10, %v273_v37  ;;  %v475_v14 = vadd.f32 %v474_v11, %v303_v3 }
  0xf0   : > { %v442_v15 = vpop.f32.mrf.mxu0  ;;  %v478_v16 = vpop.f32.mrf.mxu1 }
  0xf1   : > { %496 = vst [vmem:[#allocation2 + $0x38] sm:$0xff] %v439_v13  ;;  %508 = vst [vmem:[#allocation2 + $0x98] sm:$0xff] %v475_v14  ;;  %v443_v17 = vadd.f32 %v442_v15, %v2156_v38  ;;  %v479_v18 = vadd.f32 %v478_v16, %v308_v12 }
  0xf2   : > { %v444_v19 = vpop.f32.mrf.mxu0  ;;  %v480_v20 = vpop.f32.mrf.mxu1 }
  0xf3   : > { %497 = vst [vmem:[#allocation2 + $0x40] sm:$0xff] %v443_v17  ;;  %509 = vst [vmem:[#allocation2 + $0xa0] sm:$0xff] %v479_v18  ;;  %v445_v22 = vadd.f32 %v444_v19, %v2156_v38  ;;  %v481_v23 = vadd.f32 %v480_v20, %v308_v12 }
  0xf4   : > { %v448_v24 = vpop.f32.mrf.mxu0  ;;  %v484_v25 = vpop.f32.mrf.mxu1 }
  0xf5   : > { %498 = vst [vmem:[#allocation2 + $0x48] sm:$0xff] %v445_v22  ;;  %510 = vst [vmem:[#allocation2 + $0xa8] sm:$0xff] %v481_v23  ;;  %v449_v26 = vadd.f32 %v448_v24, %v2158_v39  ;;  %v485_v27 = vadd.f32 %v484_v25, %v313_v21 }
  0xf6   : > { %v450_v28 = vpop.f32.mrf.mxu0  ;;  %v486_v29 = vpop.f32.mrf.mxu1 }
  0xf7   : > { %499 = vst [vmem:[#allocation2 + $0x50] sm:$0xff] %v449_v26  ;;  %511 = vst [vmem:[#allocation2 + $0xb0] sm:$0xff] %v485_v27  ;;  %v451_v30 = vadd.f32 %v450_v28, %v2158_v39  ;;  %v487_v31 = vadd.f32 %v486_v29, %v313_v21 }
  0xf9   : > { %500 = vst [vmem:[#allocation2 + $0x58] sm:$0xff] %v451_v30  ;;  %512 = vst [vmem:[#allocation2 + $0xb8] sm:$0xff] %v487_v31 }
  0xfa LB: >> { %v1966_v32 = vmov 0.0   ;;  %s2174_s26 = sshll.u32 %s1962_s25, 3  ;;  %vm609_vm1 = vcmask 64512   ;;  %s518_s25 = sadd.s32 1, %s1962_s25   ;;  %s1962_s25 = sphi %s2167_s25, %s518_s25  }
  0xfb   : >> { %770 = vmatprep.mubr.f32.mxu0 %v1966_v32  ;;  %s520_s7 = sadd.s32 32, %s2174_s26  ;;  %s522_s8 = sshra.s32 %s2174_s26, 3 }
  0xfc   : >> { %s531_s9 = sshra.s32 %s520_s7, 3  ;;  %s2178_s6 = sshll.u32 %s522_s8, 4 }
  0xfd   : >> { %s1686_s10 = sshll.u32 %s531_s9, 4  ;;  %s526_s11 = scalar_lea.vmem [#allocation2], %s2178_s6 }
  0xfe   : >> { %s535_s12 = scalar_lea.vmem [#allocation2], %s1686_s10  ;;  %s521_s13 = sadd.s32 64, %s2174_s26 }
  0xff   : >> { %s538_s14 = sshra.s32 %s521_s13, 3  ;;  %s1379_s17 = scalar_lea.vmem [#allocation3], %s2178_s6 }
 0x100   : >> { %v528_v33 = vld [vmem:[%s526_s11 + $0x8] sm:$0xff]  ;;  %v527_v34 = vld [vmem:[%s526_s11] sm:$0xff]  ;;  %s1687_s15 = sshll.u32 %s538_s14, 4  ;;  %p515_p11 = scmp.ge.s32.totalorder %s518_s25, 4  }
 0x101   : >> { %v536_v35 = vld [vmem:[%s535_s12] sm:$0xff]  ;;  %v530_v36 = vmul.f32 0.35355338, %v528_v33  ;;  %v529_v37 = vmul.f32 0.35355338, %v527_v34  ;;  %v537_v38 = vld [vmem:[%s535_s12 + $0x8] sm:$0xff] }
 0x102   : >> { %545 = vxpose.xlu0.b32.start.end [1/1] (short) %v536_v35, 128  ;;  %s2459_s16 = scalar_lea.vmem [#allocation2], %s1687_s15  ;;  %s1689_s7 = sshll.u32 (%p515_p11), %s2021_s22, 10 }
 0x103   : >> { %736 = vmatprep.subr.mxu0 %v530_v36  ;;  %s1541_s8 = sshll.u32 (%p515_p11), %s2165_s23, 4  ;;  %s2808_s10 = scalar_lea.hbm (%p515_p11), %s2863_s5, %s1689_s7  ;;  %s2810_s8 = int_to_ptr.vmem [resolvable:$true] %s1541_s8 }
 0x104   : >> { %737 = vmatpush1.msra.mxu0 %v529_v37  ;;  %s2818_s22 = scalar_lea.sflag (%p515_p11), [#allocation5], %s215_s30  ;;  %s1894_s11 = scalar_lea.vmem (%p515_p11), %s2810_s8, 1024 }
 0x105   : > { %p1895_p12 = scmp.ne.s32.totalorder (%p515_p11), %s2810_s8, %s1894_s11  ;;  %s1967_s12 = smov (%p515_p11), [#allocation4]  }
 0x106   : > { %s1898_s13 = sshll.u32 (%p515_p11), %s1967_s12, 4  ;;  %s1899_s13 = int_to_ptr.vmem [resolvable:$false] %s1898_s13 }
 0x107   : > { %p1896_p13 = pnand (%p515_p11), %p1895_p12, %p2038_p5  ;;  %s1900_s14 = scalar_lea.vmem (%p515_p11), %s1899_s13, 2048 }
 0x108   : > { %p1901_p1 = scmp.lt.s32.totalorder (%p515_p11), %s2810_s8, %s1899_s13  ;;  %p1902_p2 = scmp.lt.s32.totalorder (%p515_p11), %s1900_s14, %s1894_s11 }
 0x109   : > { %p1897_p0 = pneg (%p515_p11), %p1896_p13 }
 0x10a   : > { %p1903_p3 = por (%p515_p11), %p1902_p2, %p1901_p1 }
 0x10c   : > { %p1904_p4 = pnand (%p515_p11), %p1903_p3, %p1897_p0 }
 0x13f   : >> { %577 = vxpose.xlu0.b32.start.end [1/1] (short) %v537_v38, 128 }
 0x17e   : >> { %v561_v39 = vpop.trf.xlu0 }
 0x17f   : >> { %1642 = vmatmul.mubr.msk.f32.vlgmr.msra.gmra.mxu0 %vm609_vm1, %v561_v39 }
 0x180   : >> { %776 = vmatprep.mubr.f32.mxu0 %v1966_v32 }
 0x182   : >> { %v562_v40 = vpop.trf.xlu0 }
 0x183   : >> { %1643 = vmatmul.mubr.msk.f32.gmra.mxu0 %vm609_vm1, %v562_v40 }
 0x184   : >> { %782 = vmatprep.mubr.f32.mxu0 %v1966_v32 }
 0x186   : >> { %v563_v41 = vpop.trf.xlu0 }
 0x187   : >> { %1644 = vmatmul.mubr.msk.f32.gmra.mxu0 %vm609_vm1, %v563_v41 }
 0x188   : >> { %788 = vmatprep.mubr.f32.mxu0 %v1966_v32 }
 0x18a   : >> { %v564_v42 = vpop.trf.xlu0 }
 0x18b   : >> { %1645 = vmatmul.mubr.msk.f32.gmra.mxu0 %vm609_vm1, %v564_v42 }
 0x18c   : >> { %794 = vmatprep.mubr.f32.mxu0 %v1966_v32 }
 0x18e   : >> { %v565_v43 = vpop.trf.xlu0 }
 0x18f   : >> { %1646 = vmatmul.mubr.msk.f32.gmra.mxu0 %vm609_vm1, %v565_v43 }
 0x190   : >> { %800 = vmatprep.mubr.f32.mxu0 %v1966_v32 }
 0x192   : >> { %v566_v44 = vpop.trf.xlu0 }
 0x193   : >> { %1647 = vmatmul.mubr.msk.f32.gmra.mxu0 %vm609_vm1, %v566_v44 }
 0x194   : >> { %806 = vmatprep.mubr.f32.mxu0 %v1966_v32 }
 0x196   : >> { %v567_v45 = vpop.trf.xlu0 }
 0x197   : >> { %1648 = vmatmul.mubr.msk.f32.gmra.mxu0 %vm609_vm1, %v567_v45 }
 0x198   : >> { %812 = vmatprep.mubr.f32.mxu0 %v1966_v32 }
 0x19a   : >> { %v568_v46 = vpop.trf.xlu0 }
 0x19b   : >> { %1649 = vmatmul.mubr.msk.f32.gmra.mxu0 %vm609_vm1, %v568_v46 }
 0x19c   : >> { %818 = vmatprep.mubr.f32.mxu0 %v1966_v32 }
 0x19e   : >> { %v569_v47 = vpop.trf.xlu0 }
 0x19f   : >> { %1650 = vmatmul.mubr.msk.f32.gmra.mxu0 %vm609_vm1, %v569_v47 }
 0x1a0   : >> { %824 = vmatprep.mubr.f32.mxu0 %v1966_v32 }
 0x1a2   : >> { %v570_v48 = vpop.trf.xlu0 }
 0x1a3   : >> { %1651 = vmatmul.mubr.msk.f32.gmra.mxu0 %vm609_vm1, %v570_v48 }
 0x1a4   : >> { %830 = vmatprep.mubr.f32.mxu0 %v1966_v32 }
 0x1a6   : >> { %v571_v49 = vpop.trf.xlu0 }
 0x1a7   : >> { %1652 = vmatmul.mubr.msk.f32.gmra.mxu0 %vm609_vm1, %v571_v49 }
 0x1a8   : >> { %836 = vmatprep.mubr.f32.mxu0 %v1966_v32 }
 0x1aa   : >> { %v572_v50 = vpop.trf.xlu0 }
 0x1ab   : >> { %1653 = vmatmul.mubr.msk.f32.gmra.mxu0 %vm609_vm1, %v572_v50 }
 0x1ac   : >> { %842 = vmatprep.mubr.f32.mxu0 %v1966_v32 }
 0x1ae   : >> { %v573_v51 = vpop.trf.xlu0 }
 0x1af   : >> { %1654 = vmatmul.mubr.msk.f32.gmra.mxu0 %vm609_vm1, %v573_v51 }
 0x1b0   : >> { %848 = vmatprep.mubr.f32.mxu0 %v1966_v32 }
 0x1b2   : >> { %v574_v52 = vpop.trf.xlu0 }
 0x1b3   : >> { %1655 = vmatmul.mubr.msk.f32.gmra.mxu0 %vm609_vm1, %v574_v52 }
 0x1b4   : >> { %854 = vmatprep.mubr.f32.mxu0 %v1966_v32 }
 0x1b6   : >> { %v575_v53 = vpop.trf.xlu0 }
 0x1b7   : >> { %1656 = vmatmul.mubr.msk.f32.gmra.mxu0 %vm609_vm1, %v575_v53 }
 0x1b8   : >> { %860 = vmatprep.mubr.f32.mxu0 %v1966_v32 }
 0x1ba   : >> { %v576_v54 = vpop.trf.xlu0 }
 0x1bb   : >> { %1657 = vmatmul.mubr.msk.f32.gmra.mxu0 %vm609_vm1, %v576_v54 }
 0x1bc   : >> { %866 = vmatprep.mubr.f32.mxu0 %v1966_v32 }
 0x1be   : >> { %v593_v55 = vpop.trf.xlu0 }
 0x1bf   : >> { %1658 = vmatmul.mubr.msk.f32.gmra.mxu0 %vm609_vm1, %v593_v55 }
 0x1c0   : >> { %872 = vmatprep.mubr.f32.mxu0 %v1966_v32 }
 0x1c2   : >> { %v594_v56 = vpop.trf.xlu0 }
 0x1c3   : >> { %1659 = vmatmul.mubr.msk.f32.gmra.mxu0 %vm609_vm1, %v594_v56 }
 0x1c4   : >> { %878 = vmatprep.mubr.f32.mxu0 %v1966_v32 }
 0x1c6   : >> { %v595_v57 = vpop.trf.xlu0 }
 0x1c7   : >> { %1660 = vmatmul.mubr.msk.f32.gmra.mxu0 %vm609_vm1, %v595_v57 }
 0x1c8   : >> { %884 = vmatprep.mubr.f32.mxu0 %v1966_v32 }
 0x1ca   : >> { %v596_v58 = vpop.trf.xlu0 }
 0x1cb   : >> { %1661 = vmatmul.mubr.msk.f32.gmra.mxu0 %vm609_vm1, %v596_v58 }
 0x1cc   : >> { %890 = vmatprep.mubr.f32.mxu0 %v1966_v32 }
 0x1ce   : >> { %v597_v59 = vpop.trf.xlu0 }
 0x1cf   : >> { %1662 = vmatmul.mubr.msk.f32.gmra.mxu0 %vm609_vm1, %v597_v59 }
 0x1d0   : >> { %896 = vmatprep.mubr.f32.mxu0 %v1966_v32 }
 0x1d2   : >> { %v598_v60 = vpop.trf.xlu0 }
 0x1d3   : >> { %1663 = vmatmul.mubr.msk.f32.gmra.mxu0 %vm609_vm1, %v598_v60 }
 0x1d4   : >> { %902 = vmatprep.mubr.f32.mxu0 %v1966_v32 }
 0x1d6   : >> { %v599_v61 = vpop.trf.xlu0 }
 0x1d7   : >> { %1664 = vmatmul.mubr.msk.f32.gmra.mxu0 %vm609_vm1, %v599_v61 }
 0x1d8   : >> { %908 = vmatprep.mubr.f32.mxu0 %v1966_v32 }
 0x1da   : >> { %v600_v62 = vpop.trf.xlu0 }
 0x1db   : >> { %1665 = vmatmul.mubr.msk.f32.gmra.mxu0 %vm609_vm1, %v600_v62 }
 0x1dc   : >> { %914 = vmatprep.mubr.f32.mxu0 %v1966_v32 }
 0x1de   : >> { %v601_v63 = vpop.trf.xlu0 }
 0x1df   : >> { %1666 = vmatmul.mubr.msk.f32.gmra.mxu0 %vm609_vm1, %v601_v63 }
 0x1e0   : >> { %920 = vmatprep.mubr.f32.mxu0 %v1966_v32 }
 0x1e2   : >> { %v602_v2 = vpop.trf.xlu0 }
 0x1e3   : >> { %1667 = vmatmul.mubr.msk.f32.gmra.mxu0 %vm609_vm1, %v602_v2 }
 0x1e4   : >> { %926 = vmatprep.mubr.f32.mxu0 %v1966_v32 }
 0x1e6   : >> { %v603_v3 = vpop.trf.xlu0 }
 0x1e7   : >> { %1668 = vmatmul.mubr.msk.f32.gmra.mxu0 %vm609_vm1, %v603_v3 }
 0x1e8   : >> { %932 = vmatprep.mubr.f32.mxu0 %v1966_v32 }
 0x1ea   : >> { %v604_v4 = vpop.trf.xlu0 }
 0x1eb   : >> { %1669 = vmatmul.mubr.msk.f32.gmra.mxu0 %vm609_vm1, %v604_v4 }
 0x1ec   : >> { %938 = vmatprep.mubr.f32.mxu0 %v1966_v32 }
 0x1ee   : >> { %v605_v5 = vpop.trf.xlu0 }
 0x1ef   : >> { %1670 = vmatmul.mubr.msk.f32.gmra.mxu0 %vm609_vm1, %v605_v5 }
 0x1f0   : >> { %944 = vmatprep.mubr.f32.mxu0 %v1966_v32 }
 0x1f2   : >> { %v606_v6 = vpop.trf.xlu0 }
 0x1f3   : >> { %1671 = vmatmul.mubr.msk.f32.gmra.mxu0 %vm609_vm1, %v606_v6 }
 0x1f4   : >> { %950 = vmatprep.mubr.f32.mxu0 %v1966_v32 }
 0x1f6   : >> { %v607_v7 = vpop.trf.xlu0 }
 0x1f7   : >> { %1672 = vmatmul.mubr.msk.f32.gmra.mxu0 %vm609_vm1, %v607_v7 }
 0x1f8   : >> { %956 = vmatprep.mubr.f32.mxu0 %v1966_v32 }
 0x1fa   : >> { %v608_v8 = vpop.trf.xlu0 }
 0x1fb   : >> { %1673 = vmatmul.mubr.msk.f32.gmra.mxu0 %vm609_vm1, %v608_v8 }
 0x23f   : >> { %v2244_v9 = vpop.f32.mrf.mxu0 }
 0x241   : >> { %v2246_v10 = vpop.f32.mrf.mxu0 }
 0x243   : >> { %v2248_v11 = vpop.f32.mrf.mxu0 }
 0x245   : >> { %v2250_v12 = vpop.f32.mrf.mxu0 }
 0x246   : >> { %2890 = vst [vmem:[#allocation7_spill] sm:$0xff] %v2250_v12 }
 0x247   : >> { %v2252_v13 = vpop.f32.mrf.mxu0 }
 0x248   : >> { %v963_v58 = vmax.f32 %v2244_v9, %v2252_v13 }
 0x249   : >> { %v2254_v14 = vpop.f32.mrf.mxu0 }
 0x24a   : >> { %2891 = vst [vmem:[#allocation8_spill] sm:$0xff] %v2254_v14 }
 0x24b   : >> { %v2256_v15 = vpop.f32.mrf.mxu0 }
 0x24c   : >> { %v964_v59 = vmax.f32 %v2248_v11, %v2256_v15 }
 0x24d   : >> { %v2258_v16 = vpop.f32.mrf.mxu0 }
 0x24e   : >> { %2892 = vst [vmem:[#allocation9_spill] sm:$0xff] %v2258_v16 }
 0x24f   : >> { %v2260_v17 = vpop.f32.mrf.mxu0 }
 0x250   : >> { %v965_v61 = vmax.f32 %v963_v58, %v2260_v17 }
 0x251   : >> { %v2262_v18 = vpop.f32.mrf.mxu0 }
 0x253   : >> { %v2264_v19 = vpop.f32.mrf.mxu0 }
 0x254   : >> { %v966_v62 = vmax.f32 %v964_v59, %v2264_v19 }
 0x255   : >> { %v2266_v20 = vpop.f32.mrf.mxu0 }
 0x256   : >> { %2893 = vst [vmem:[#allocation10_spill] sm:$0xff] %v2266_v20 }
 0x257   : >> { %v2268_v21 = vpop.f32.mrf.mxu0 }
 0x258   : >> { %v967_v2 = vmax.f32 %v965_v61, %v2268_v21 }
 0x259   : >> { %v2270_v22 = vpop.f32.mrf.mxu0 }
 0x25b   : >> { %v2272_v23 = vpop.f32.mrf.mxu0 }
 0x25c   : >> { %v968_v3 = vmax.f32 %v966_v62, %v2272_v23 }
 0x25d   : >> { %v2274_v24 = vpop.f32.mrf.mxu0 }
 0x25e   : >> { %2894 = vst [vmem:[#allocation11_spill] sm:$0xff] %v2274_v24 }
 0x25f   : >> { %v2276_v25 = vpop.f32.mrf.mxu0 }
 0x260   : >> { %2895 = vst [vmem:[#allocation12_spill] sm:$0xff] %v2276_v25  ;;  %v969_v5 = vmax.f32 %v967_v2, %v2276_v25 }
 0x261   : >> { %v2278_v26 = vpop.f32.mrf.mxu0 }
 0x262   : >> { %2896 = vst [vmem:[#allocation13_spill] sm:$0xff] %v2278_v26 }
 0x263   : >> { %v2280_v27 = vpop.f32.mrf.mxu0 }
 0x264   : >> { %v970_v6 = vmax.f32 %v968_v3, %v2280_v27 }
 0x265   : >> { %v2282_v28 = vpop.f32.mrf.mxu0 }
 0x266   : >> { %2897 = vst [vmem:[#allocation14_spill] sm:$0xff] %v2282_v28 }
 0x267   : >> { %v2284_v29 = vpop.f32.mrf.mxu0 }
 0x268   : >> { %2898 = vst [vmem:[#allocation15_spill] sm:$0xff] %v2284_v29  ;;  %v971_v8 = vmax.f32 %v969_v5, %v2284_v29 }
 0x269   : >> { %v2286_v30 = vpop.f32.mrf.mxu0 }
 0x26b   : >> { %v2288_v31 = vpop.f32.mrf.mxu0 }
 0x26c   : >> { %v972_v58 = vmax.f32 %v970_v6, %v2288_v31 }
 0x26d   : >> { %v2290_v32 = vpop.f32.mrf.mxu0 }
 0x26f   : >> { %v2292_v33 = vpop.f32.mrf.mxu0 }
 0x270   : >> { %2899 = vst [vmem:[#allocation16_spill] sm:$0xff] %v2292_v33  ;;  %v973_v59 = vmax.f32 %v971_v8, %v2292_v33 }
 0x271   : >> { %v2294_v34 = vpop.f32.mrf.mxu0 }
 0x273   : >> { %v2296_v35 = vpop.f32.mrf.mxu0 }
 0x274   : >> { %v974_v61 = vmax.f32 %v972_v58, %v2296_v35  ;;  %v1001_v58 = vmax.f32 %v2250_v12, %v2258_v16 }
 0x275   : >> { %v2298_v36 = vpop.f32.mrf.mxu0 }
 0x277   : >> { %v2300_v37 = vpop.f32.mrf.mxu0 }
 0x278   : >> { %v975_v62 = vmax.f32 %v973_v59, %v2300_v37 }
 0x279   : >> { %v2302_v38 = vpop.f32.mrf.mxu0 }
 0x27b   : >> { %v2304_v39 = vpop.f32.mrf.mxu0 }
 0x27c   : >> { %2900 = vst [vmem:[#allocation17_spill] sm:$0xff] %v2304_v39  ;;  %v976_v2 = vmax.f32 %v974_v61, %v2304_v39 }
 0x27d   : >> { %v2306_v40 = vpop.f32.mrf.mxu0 }
 0x27f   : >> { %v2308_v41 = vpop.f32.mrf.mxu0 }
 0x280   : >> { %v977_v3 = vmax.f32 %v975_v62, %v2308_v41  ;;  %v1000_v62 = vmax.f32 %v2246_v10, %v2254_v14 }
 0x281   : >> { %v2310_v42 = vpop.f32.mrf.mxu0 }
 0x283   : >> { %v2312_v43 = vpop.f32.mrf.mxu0 }
 0x284   : >> { %v978_v5 = vmax.f32 %v976_v2, %v2312_v43  ;;  %v1003_v2 = vmax.f32 %v1001_v58, %v2266_v20 }
 0x285   : >> { %v2314_v44 = vpop.f32.mrf.mxu0 }
 0x286   : >> { %v1005_v16 = vmax.f32 %v1003_v2, %v2274_v24 }
 0x287   : >> { %v2316_v45 = vpop.f32.mrf.mxu0 }
 0x288   : >> { %2901 = vst [vmem:[#allocation18_spill] sm:$0xff] %v2316_v45  ;;  %v979_v6 = vmax.f32 %v977_v3, %v2316_v45  ;;  %v1002_v45 = vmax.f32 %v1000_v62, %v2262_v18  ;;  %v1007_v58 = vmax.f32 %v1005_v16, %v2282_v28 }
 0x289   : >> { %v2318_v46 = vpop.f32.mrf.mxu0 }
 0x28a   : >> { %v1004_v14 = vmax.f32 %v1002_v45, %v2270_v22  ;;  %v1009_v2 = vmax.f32 %v1007_v58, %v2290_v32 }
 0x28b   : >> { %v2320_v47 = vpop.f32.mrf.mxu0 }
 0x28c   : >> { %2902 = vst [vmem:[#allocation19_spill] sm:$0xff] %v2320_v47  ;;  %v980_v8 = vmax.f32 %v978_v5, %v2320_v47  ;;  %v1006_v62 = vmax.f32 %v1004_v14, %v2278_v26  ;;  %v1011_v16 = vmax.f32 %v1009_v2, %v2298_v36 }
 0x28d   : >> { %v2322_v48 = vpop.f32.mrf.mxu0 }
 0x28e   : >> { %v1008_v45 = vmax.f32 %v1006_v62, %v2286_v30  ;;  %v1013_v14 = vmax.f32 %v1011_v16, %v2306_v40 }
 0x28f   : >> { %v2324_v49 = vpop.f32.mrf.mxu0 }
 0x290   : >> { %v981_v59 = vmax.f32 %v979_v6, %v2324_v49  ;;  %v1010_v28 = vmax.f32 %v1008_v45, %v2294_v34 }
 0x291   : >> { %v2326_v50 = vpop.f32.mrf.mxu0 }
 0x292   : >> { %v1012_v58 = vmax.f32 %v1010_v28, %v2302_v38 }
 0x293   : >> { %v2328_v51 = vpop.f32.mrf.mxu0 }
 0x294   : >> { %v982_v61 = vmax.f32 %v980_v8, %v2328_v51 }
 0x295   : >> { %v2330_v52 = vpop.f32.mrf.mxu0 }
 0x297   : >> { %v2332_v53 = vpop.f32.mrf.mxu0 }
 0x298   : >> { %v983_v3 = vmax.f32 %v981_v59, %v2332_v53 }
 0x299   : >> { %v2334_v54 = vpop.f32.mrf.mxu0 }
 0x29b   : >> { %v2336_v55 = vpop.f32.mrf.mxu0 }
 0x29c   : >> { %v984_v5 = vmax.f32 %v982_v61, %v2336_v55 }
 0x29d   : >> { %v2338_v56 = vpop.f32.mrf.mxu0 }
 0x29f   : >> { %v2340_v57 = vpop.f32.mrf.mxu0 }
 0x2a0   : >> { %v985_v6 = vmax.f32 %v983_v3, %v2340_v57 }
 0x2a1   : >> { %v2346_v60 = vpop.f32.mrf.mxu0 }
 0x2a3   : >> { %v2350_v63 = vpop.f32.mrf.mxu0 }
 0x2a4   : >> { %v986_v8 = vmax.f32 %v984_v5, %v2350_v63 }
 0x2a5   : >> { %v2354_v4 = vpop.f32.mrf.mxu0 }
 0x2a7   : >> { %v2358_v7 = vpop.f32.mrf.mxu0 }
 0x2a8   : >> { %v987_v59 = vmax.f32 %v985_v6, %v2358_v7 }
 0x2a9   : >> { %v2362_v1 = vpop.f32.mrf.mxu0 }
 0x2ab   : >> { %v2366_v0 = vpop.f32.mrf.mxu0 }
 0x2ac   : >> { %v988_v61 = vmax.f32 %v986_v8, %v2366_v0 }
 0x2ad   : >> { %v2370_v25 = vpop.f32.mrf.mxu0 }
 0x2af   : >> { %v2374_v29 = vpop.f32.mrf.mxu0 }
 0x2b0   : >> { %2903 = vst [vmem:[#allocation20_spill] sm:$0xff] %v2374_v29  ;;  %v989_v3 = vmax.f32 %v987_v59, %v2374_v29  ;;  %v1015_v59 = vmax.f32 %v1013_v14, %v2314_v44 }
 0x2b1   : >> { %v2378_v33 = vpop.f32.mrf.mxu0 }
 0x2b2   : >> { %v1017_v62 = vmax.f32 %v1015_v59, %v2322_v48 }
 0x2b3   : >> { %v2384_v39 = vpop.f32.mrf.mxu0 }
 0x2b4   : >> { %2904 = vst [vmem:[#allocation21_spill] sm:$0xff] %v2384_v39  ;;  %v990_v5 = vmax.f32 %v988_v61, %v2384_v39  ;;  %v1014_v39 = vmax.f32 %v1012_v58, %v2310_v42 }
 0x2b5   : >> { %v2391_v47 = vpop.f32.mrf.mxu0 }
 0x2b6   : >> { %v1016_v2 = vmax.f32 %v1014_v39, %v2318_v46 }
 0x2b7   : >> { %v2397_v12 = vpop.f32.mrf.mxu0 }
 0x2b8   : >> { %v991_v6 = vmax.f32 %v989_v3, %v2397_v12  ;;  %v1019_v3 = vmax.f32 %v1017_v62, %v2330_v52  ;;  %v1018_v45 = vmax.f32 %v1016_v2, %v2326_v50 }
 0x2b9   : >> { %v2403_v20 = vpop.f32.mrf.mxu0 }
 0x2ba   : >> { %v1021_v16 = vmax.f32 %v1019_v3, %v2338_v56  ;;  %v1020_v28 = vmax.f32 %v1018_v45, %v2334_v54 }
 0x2bb   : >> { %v2409_v24 = vpop.f32.mrf.mxu0 }
 0x2bc   : >> { %v992_v8 = vmax.f32 %v990_v5, %v2409_v24  ;;  %v1022_v58 = vmax.f32 %v1020_v28, %v2346_v60 }
 0x2be   : >> { %v993_v26 = vmax.f32 %v991_v6, %v992_v8  ;;  %v1023_v8 = vmax.f32 %v1021_v16, %v2354_v4  ;;  %v1024_v39 = vmax.f32 %v1022_v58, %v2362_v1 }
 0x2c0   : >> { %v994_v61 = vrot.slane %v993_v26, 4  ;;  %v1025_v59 = vmax.f32 %v1023_v8, %v2370_v25  ;;  %v1026_v2 = vmax.f32 %v1024_v39, %v2378_v33 }
 0x2c2   : >> { %v995_v29 = vmax.f32 %v993_v26, %v994_v61  ;;  %v2429_v26 = vpop.f32.mrf.mxu0  ;;  %v1027_v61 = vmax.f32 %v1025_v59, %v2391_v47  ;;  %v1028_v3 = vmax.f32 %v1026_v2, %v2403_v20 }
 0x2c4   : >> { %v996_v5 = vrot.slane %v995_v29, 2 }
 0x2c6   : >> { %v997_v6 = vmax.f32 %v995_v29, %v996_v5  ;;  %v1029_v29 = vmax.f32 %v1027_v61, %v2429_v26 }
 0x2c8   : >> { %v998_v14 = vrot.slane %v997_v6, 1  ;;  %v1030_v28 = vmax.f32 %v1028_v3, %v1029_v29  ;;  %v2905_v29 = vld [vmem:[#allocation12_spill] sm:$0xff] }
 0x2ca   : >> { %v2433_v62 = vmax.f32 %v997_v6, %v998_v14  ;;  %v1031_v39 = vrot.slane %v1030_v28, 4 }
 0x2cc   : >> { %v1037_v5 = vsub.f32 %v2244_v9, %v2433_v62  ;;  %v1039_v45 = vsub.f32 %v2248_v11, %v2433_v62  ;;  %v1041_v16 = vsub.f32 %v2252_v13, %v2433_v62  ;;  %v1043_v6 = vsub.f32 %v2256_v15, %v2433_v62 }
 0x2cd   : >> { %v1045_v58 = vsub.f32 %v2260_v17, %v2433_v62  ;;  %v1047_v9 = vsub.f32 %v2264_v19, %v2433_v62  ;;  %v1049_v13 = vsub.f32 %v2268_v21, %v2433_v62  ;;  %v1032_v15 = vmax.f32 %v1030_v28, %v1031_v39  ;;  %v2907_v39 = vld [vmem:[#allocation16_spill] sm:$0xff] }
 0x2ce   : >> { %v1101_v8 = vmul.f32 1.442695, %v1037_v5  ;;  %v1105_v14 = vmul.f32 1.442695, %v1039_v45  ;;  %v1109_v59 = vmul.f32 1.442695, %v1041_v16  ;;  %v1051_v2 = vsub.f32 %v2272_v23, %v2433_v62 }
 0x2cf   : >> { %v1113_v11 = vmul.f32 1.442695, %v1043_v6  ;;  %v1117_v61 = vmul.f32 1.442695, %v1045_v58  ;;  %v1121_v17 = vmul.f32 1.442695, %v1047_v9  ;;  %v1053_v3 = vsub.f32 %v2905_v29, %v2433_v62 }
 0x2d0   : >> { %1760 = vpow2.f32 %v1101_v8  ;;  %v1125_v19 = vmul.f32 1.442695, %v1049_v13  ;;  %v1033_v5 = vrot.slane %v1032_v15, 2  ;;  %v1055_v45 = vsub.f32 %v2280_v27, %v2433_v62  ;;  %v544_v16 = vld [vmem:[%s2459_s16 + $0x8] sm:$0xff]  ;;  %v2906_v23 = vld [vmem:[#allocation15_spill] sm:$0xff] }
 0x2d1   : >> { %1762 = vpow2.f32 %v1105_v14  ;;  %v1129_v21 = vmul.f32 1.442695, %v1051_v2  ;;  %v1057_v28 = vsub.f32 %v2906_v23, %v2433_v62  ;;  %v1133_v6 = vmul.f32 1.442695, %v1053_v3  ;;  %1367 = vmatprep.mubr.f32.mxu1 %v544_v16 }
 0x2d2   : >> { %1764 = vpow2.f32 %v1109_v59  ;;  %v1034_v8 = vmax.f32 %v1032_v15, %v1033_v5  ;;  %v1059_v58 = vsub.f32 %v2288_v31, %v2433_v62  ;;  %v1137_v27 = vmul.f32 1.442695, %v1055_v45 }
 0x2d3   : >> { %1766 = vpow2.f32 %v1113_v11  ;;  %v1061_v9 = vsub.f32 %v2907_v39, %v2433_v62  ;;  %v1063_v11 = vsub.f32 %v2296_v35, %v2433_v62  ;;  %v1141_v13 = vmul.f32 1.442695, %v1057_v28  ;;  %v2909_v28 = vld [vmem:[#allocation18_spill] sm:$0xff]  ;;  %v2910_v39 = vld [vmem:[#allocation19_spill] sm:$0xff] }
 0x2d4   : >> { %1768 = vpow2.f32 %v1117_v61  ;;  %v1065_v31 = vsub.f32 %v2300_v37, %v2433_v62  ;;  %v1035_v2 = vrot.slane %v1034_v8, 1  ;;  %v1145_v3 = vmul.f32 1.442695, %v1059_v58 }
 0x2d5   : >> { %1770 = vpow2.f32 %v1121_v17  ;;  %v2908_v17 = vld [vmem:[#allocation17_spill] sm:$0xff]  ;;  %v1069_v35 = vsub.f32 %v2308_v41, %v2433_v62  ;;  %v1149_v45 = vmul.f32 1.442695, %v1061_v9  ;;  %v1153_v16 = vmul.f32 1.442695, %v1063_v11 }
 0x2d6   : >> { %1772 = vpow2.f32 %v1125_v19  ;;  %v1067_v29 = vsub.f32 %v2908_v17, %v2433_v62  ;;  %v1157_v58 = vmul.f32 1.442695, %v1065_v31  ;;  %v1077_v11 = vsub.f32 %v2324_v49, %v2433_v62 }
 0x2d7   : >> { %1774 = vpow2.f32 %v1129_v21  ;;  %v1071_v21 = vsub.f32 %v2312_v43, %v2433_v62  ;;  %v1079_v17 = vsub.f32 %v2328_v51, %v2433_v62  ;;  %v1081_v51 = vsub.f32 %v2332_v53, %v2433_v62  ;;  %v2913_v53 = vld [vmem:[#allocation9_spill] sm:$0xff] }
 0x2d8   : >> { %1776 = vpow2.f32 %v1133_v6  ;;  %v1073_v6 = vsub.f32 %v2909_v28, %v2433_v62  ;;  %v1161_v41 = vmul.f32 1.442695, %v1067_v29 }
 0x2d9   : >> { %1778 = vpow2.f32 %v1137_v27  ;;  %v2494_v27 = vmax.f32 %v1034_v8, %v1035_v2  ;;  %v1169_v8 = vmul.f32 1.442695, %v1071_v21  ;;  %v1181_v21 = vmul.f32 1.442695, %v1077_v11 }
 0x2da   : >> { %1780 = vpow2.f32 %v1141_v13  ;;  %v1165_v13 = vmul.f32 1.442695, %v1069_v35  ;;  %v1173_v29 = vmul.f32 1.442695, %v1073_v6  ;;  %v2911_v35 = vld [vmem:[#allocation7_spill] sm:$0xff] }
 0x2db   : >> { %1782 = vpow2.f32 %v1145_v3  ;;  %v1038_v3 = vsub.f32 %v2246_v10, %v2494_v27  ;;  %v2912_v10 = vld [vmem:[#allocation8_spill] sm:$0xff] }
 0x2dc   : >> { %1784 = vpow2.f32 %v1149_v45  ;;  %v1040_v45 = vsub.f32 %v2911_v35, %v2494_v27  ;;  %v1042_v6 = vsub.f32 %v2912_v10, %v2494_v27  ;;  %v1050_v10 = vsub.f32 %v2270_v22, %v2494_v27 }
 0x2dd   : >> { %v2464_v14 = vpop.eup %1760  ;;  %1786 = vpow2.f32 %v1153_v16  ;;  %v1185_v16 = vmul.f32 1.442695, %v1079_v17  ;;  %v1085_v17 = vsub.f32 %v2340_v57, %v2433_v62  ;;  %v2914_v57 = vld [vmem:[#allocation10_spill] sm:$0xff] }
 0x2de   : >> { %v2468_v59 = vpop.eup %1762  ;;  %1788 = vpow2.f32 %v1157_v58  ;;  %v1107_v11 = vmul.f32 1.442695, %v1040_v45  ;;  %v1048_v45 = vsub.f32 %v2914_v57, %v2494_v27 }
 0x2df   : >> { %v1229_v61 = vadd.f32 %v2468_v59, %v2464_v14  ;;  %v2476_v15 = vpop.eup %1764  ;;  %1790 = vpow2.f32 %v1161_v41 }
 0x2e0   : >> { %v2483_v5 = vpop.eup %1766  ;;  %1792 = vpow2.f32 %v1165_v13 }
 0x2e1   : >> { %v1230_v19 = vadd.f32 %v2476_v15, %v1229_v61  ;;  %v2490_v23 = vpop.eup %1768  ;;  %v1075_v61 = vsub.f32 %v2910_v39, %v2433_v62  ;;  %1794 = vpow2.f32 %v1169_v8  ;;  %v1083_v39 = vsub.f32 %v2336_v55, %v2433_v62 }
 0x2e2   : >> { %v2499_v43 = vpop.eup %1770  ;;  %1796 = vpow2.f32 %v1173_v29  ;;  %v1189_v8 = vmul.f32 1.442695, %v1081_v51  ;;  %v1046_v55 = vsub.f32 %v2262_v18, %v2494_v27  ;;  %v1111_v29 = vmul.f32 1.442695, %v1042_v6 }
 0x2e3   : >> { %v1231_v37 = vadd.f32 %v2483_v5, %v1230_v19  ;;  %v2506_v2 = vpop.eup %1772  ;;  %v1177_v19 = vmul.f32 1.442695, %v1075_v61  ;;  %v1103_v61 = vmul.f32 1.442695, %v1038_v3  ;;  %v1089_v18 = vsub.f32 %v2358_v7, %v2433_v62 }
 0x2e4   : >> { %v1119_v6 = vmul.f32 1.442695, %v1046_v55 }
 0x2e5   : >> { %v1232_v9 = vadd.f32 %v2490_v23, %v1231_v37  ;;  %v2513_v37 = vpop.eup %1774  ;;  %1798 = vpow2.f32 %v1177_v19  ;;  %v1087_v19 = vsub.f32 %v2350_v63, %v2433_v62  ;;  %v1205_v22 = vmul.f32 1.442695, %v1089_v18 }
 0x2e6   : >> { %v2520_v58 = vpop.eup %1776  ;;  %1800 = vpow2.f32 %v1181_v21 }
 0x2e7   : >> { %v1233_v31 = vadd.f32 %v2499_v43, %v1232_v9  ;;  %v1044_v9 = vsub.f32 %v2913_v53, %v2494_v27  ;;  %v2527_v13 = vpop.eup %1778  ;;  %1802 = vpow2.f32 %v1185_v16  ;;  %v1197_v16 = vmul.f32 1.442695, %v1085_v17 }
 0x2e8   : >> { %v2534_v3 = vpop.eup %1780  ;;  %1804 = vpow2.f32 %v1103_v61  ;;  %v1091_v61 = vsub.f32 %v2366_v0, %v2433_v62  ;;  %v1123_v17 = vmul.f32 1.442695, %v1048_v45  ;;  %v2919_v45 = vld [vmem:[#allocation14_spill] sm:$0xff] }
 0x2e9   : >> { %v1234_v49 = vadd.f32 %v2506_v2, %v1233_v31  ;;  %1806 = vpow2.f32 %v1107_v11  ;;  %v1115_v51 = vmul.f32 1.442695, %v1044_v9  ;;  %v2541_v21 = vpop.eup %1782  ;;  %v2915_v9 = vld [vmem:[#allocation11_spill] sm:$0xff] }
 0x2ea   : >> { %1808 = vpow2.f32 %v1189_v8  ;;  %v1052_v11 = vsub.f32 %v2915_v9, %v2494_v27  ;;  %v1209_v57 = vmul.f32 1.442695, %v1091_v61 }
 0x2eb   : >> { %v1235_v28 = vadd.f32 %v2513_v37, %v1234_v49  ;;  %v1193_v49 = vmul.f32 1.442695, %v1083_v39  ;;  %1810 = vpow2.f32 %v1111_v29 }
 0x2ed   : >> { %v1236_v41 = vadd.f32 %v2520_v58, %v1235_v28  ;;  %v2545_v28 = vpop.eup %1784  ;;  %1812 = vpow2.f32 %v1193_v49  ;;  %v1127_v49 = vmul.f32 1.442695, %v1050_v10 }
 0x2ee   : >> { %v2550_v39 = vpop.eup %1786  ;;  %1814 = vpow2.f32 %v1115_v51  ;;  %v1056_v51 = vsub.f32 %v2919_v45, %v2494_v27 }
 0x2ef   : >> { %v1237_v31 = vadd.f32 %v2527_v13, %v1236_v41  ;;  %v1201_v41 = vmul.f32 1.442695, %v1087_v19  ;;  %v2554_v53 = vpop.eup %1788  ;;  %1816 = vpow2.f32 %v1197_v16  ;;  %v1068_v19 = vsub.f32 %v2306_v40, %v2494_v27 }
 0x2f0   : >> { %v2559_v8 = vpop.eup %1790  ;;  %1818 = vpow2.f32 %v1119_v6  ;;  %v1058_v40 = vsub.f32 %v2286_v30, %v2494_v27 }
 0x2f1   : >> { %v1238_v35 = vadd.f32 %v2534_v3, %v1237_v31  ;;  %v2916_v31 = vld [vmem:[#allocation13_spill] sm:$0xff]  ;;  %v2563_v29 = vpop.eup %1792  ;;  %1820 = vpow2.f32 %v1201_v41  ;;  %v1064_v41 = vsub.f32 %v2298_v36, %v2494_v27  ;;  %v2923_v36 = vld [vmem:[#allocation20_spill] sm:$0xff] }
 0x2f2   : >> { %v1054_v55 = vsub.f32 %v2916_v31, %v2494_v27  ;;  %2917 = vst [vmem:[#allocation12_spill] sm:$0xff] %v2563_v29  ;;  %1822 = vpow2.f32 %v1123_v17  ;;  %v1163_v31 = vmul.f32 1.442695, %v1068_v19  ;;  %v1093_v19 = vsub.f32 %v2923_v36, %v2433_v62 }
 0x2f3   : >> { %v1239_v63 = vadd.f32 %v2541_v21, %v1238_v35  ;;  %v2568_v35 = vpop.eup %1794  ;;  %1824 = vpow2.f32 %v1205_v22  ;;  %v1062_v22 = vsub.f32 %v2294_v34, %v2494_v27  ;;  %v2924_v34 = vld [vmem:[#allocation21_spill] sm:$0xff] }
 0x2f4   : >> { %2918 = vst [vmem:[#allocation15_spill] sm:$0xff] %v2568_v35  ;;  %v2572_v18 = vpop.eup %1796  ;;  %v1135_v10 = vmul.f32 1.442695, %v1054_v55  ;;  %1826 = vpow2.f32 %v1127_v49  ;;  %v1143_v49 = vmul.f32 1.442695, %v1058_v40 }
 0x2f5   : >> { %v1240_v7 = vadd.f32 %v2545_v28, %v1239_v63  ;;  %2920 = vst [vmem:[#allocation16_spill] sm:$0xff] %v2572_v18  ;;  %v1066_v63 = vsub.f32 %v2302_v38, %v2494_v27  ;;  %v2577_v9 = vpop.eup %1798  ;;  %1828 = vpow2.f32 %v1209_v57  ;;  %v1060_v38 = vsub.f32 %v2290_v32, %v2494_v27 }
 0x2f6   : >> { %2921 = vst [vmem:[#allocation17_spill] sm:$0xff] %v2577_v9  ;;  %v2581_v6 = vpop.eup %1800 }
 0x2f7   : >> { %v1241_v0 = vadd.f32 %v2550_v39, %v1240_v7  ;;  %v1131_v7 = vmul.f32 1.442695, %v1052_v11  ;;  %2922 = vst [vmem:[#allocation18_spill] sm:$0xff] %v2581_v6  ;;  %v1139_v11 = vmul.f32 1.442695, %v1056_v51 }
 0x2f8   : >> { %v1159_v55 = vmul.f32 1.442695, %v1066_v63  ;;  %v1155_v51 = vmul.f32 1.442695, %v1064_v41  ;;  %v1095_v63 = vsub.f32 %v2924_v34, %v2433_v62 }
 0x2f9   : >> { %v1242_v16 = vadd.f32 %v2554_v53, %v1241_v0  ;;  %v2586_v0 = vpop.eup %1802  ;;  %1830 = vpow2.f32 %v1131_v7  ;;  %v1147_v7 = vmul.f32 1.442695, %v1060_v38 }
 0x2fa   : >> { %v2590_v17 = vpop.eup %1804  ;;  %1832 = vpow2.f32 %v1135_v10  ;;  %v1151_v10 = vmul.f32 1.442695, %v1062_v22  ;;  %v1099_v22 = vsub.f32 %v2409_v24, %v2433_v62  ;;  %v1070_v24 = vsub.f32 %v2310_v42, %v2494_v27 }
 0x2fb   : >> { %v1243_v61 = vadd.f32 %v2559_v8, %v1242_v16  ;;  %v2595_v45 = vpop.eup %1806  ;;  %1834 = vpow2.f32 %v1163_v31  ;;  %v1097_v31 = vsub.f32 %v2397_v12, %v2433_v62  ;;  %v1074_v42 = vsub.f32 %v2318_v46, %v2494_v27 }
 0x2fc   : >> { %v2599_v57 = vpop.eup %1808  ;;  %v1266_v16 = vadd.f32 %v2595_v45, %v2590_v17  ;;  %1836 = vpow2.f32 %v1139_v11 }
 0x2fd   : >> { %v1244_v30 = vadd.f32 %v2563_v29, %v1243_v61  ;;  %v2604_v61 = vpop.eup %1810  ;;  %1838 = vpow2.f32 %v1159_v55 }
 0x2fe   : >> { %v2608_v29 = vpop.eup %1812  ;;  %1840 = vpow2.f32 %v1143_v49 }
 0x2ff   : >> { %v1245_v32 = vadd.f32 %v2568_v35, %v1244_v30  ;;  %v1267_v30 = vadd.f32 %v2604_v61, %v1266_v16  ;;  %v2612_v41 = vpop.eup %1814  ;;  %v1213_v35 = vmul.f32 1.442695, %v1093_v19  ;;  %1842 = vpow2.f32 %v1155_v51 }
 0x300   : >> { %v2616_v36 = vpop.eup %1816  ;;  %1844 = vpow2.f32 %v1147_v7  ;;  %v1221_v16 = vmul.f32 1.442695, %v1097_v31  ;;  %v1072_v31 = vsub.f32 %v2314_v44, %v2494_v27  ;;  %v1076_v44 = vsub.f32 %v2322_v48, %v2494_v27 }
 0x301   : >> { %v1246_v40 = vadd.f32 %v2572_v18, %v1245_v32  ;;  %v1268_v38 = vadd.f32 %v2612_v41, %v1267_v30  ;;  %v2620_v34 = vpop.eup %1818  ;;  %v1217_v32 = vmul.f32 1.442695, %v1095_v63  ;;  %1846 = vpow2.f32 %v1151_v10 }
 0x302   : >> { %v2624_v55 = vpop.eup %1820  ;;  %1848 = vpow2.f32 %v1213_v35  ;;  %v1225_v63 = vmul.f32 1.442695, %v1099_v22  ;;  %v1171_v18 = vmul.f32 1.442695, %v1072_v31  ;;  %v1175_v48 = vmul.f32 1.442695, %v1074_v42 }
 0x303   : >> { %v1247_v11 = vadd.f32 %v2577_v9, %v1246_v40  ;;  %v1269_v49 = vadd.f32 %v2620_v34, %v1268_v38  ;;  %v2628_v19 = vpop.eup %1822  ;;  %1850 = vpow2.f32 %v1217_v32  ;;  %v1080_v31 = vsub.f32 %v2330_v52, %v2494_v27 }
 0x304   : >> { %v2630_v51 = vpop.eup %1824  ;;  %1852 = vpow2.f32 %v1221_v16 }
 0x305   : >> { %v1248_v12 = vadd.f32 %v2581_v6, %v1247_v11  ;;  %v1270_v62 = vadd.f32 %v2628_v19, %v1269_v49  ;;  %v2636_v7 = vpop.eup %1826  ;;  %1854 = vpow2.f32 %v1225_v63 }
 0x306   : >> { %v2638_v30 = vpop.eup %1828 }
 0x307   : >> { %v1249_v40 = vadd.f32 %v2586_v0, %v1248_v12  ;;  %v1271_v35 = vadd.f32 %v2636_v7, %v1270_v62  ;;  %v2644_v11 = vpop.eup %1830  ;;  %v1167_v12 = vmul.f32 1.442695, %v1070_v24  ;;  %v1078_v24 = vsub.f32 %v2326_v50, %v2494_v27 }
 0x308   : >> { %v2648_v38 = vpop.eup %1832  ;;  %v1179_v50 = vmul.f32 1.442695, %v1076_v44  ;;  %v1187_v44 = vmul.f32 1.442695, %v1080_v31  ;;  %v1098_v31 = vsub.f32 %v2403_v20, %v2494_v27 }
 0x309   : >> { %v1250_v10 = vadd.f32 %v2599_v57, %v1249_v40  ;;  %v1272_v32 = vadd.f32 %v2644_v11, %v1271_v35  ;;  %v2652_v49 = vpop.eup %1834  ;;  %1856 = vpow2.f32 %v1167_v12  ;;  %v1082_v12 = vsub.f32 %v2334_v54, %v2494_v27 }
 0x30a   : >> { %v1837_v40 = vpop.eup %1836  ;;  %1303 = vmatprep.subr.mxu1 %v2652_v49  ;;  %1858 = vpow2.f32 %v1171_v18  ;;  %v1084_v18 = vsub.f32 %v2338_v56, %v2494_v27 }
 0x30b   : >> { %v1251_v22 = vadd.f32 %v2608_v29, %v1250_v10  ;;  %v1273_v46 = vadd.f32 %v2648_v38, %v1272_v32  ;;  %v1839_v16 = vpop.eup %1838  ;;  %1304 = vmatpush1.msra.mxu1 %v2559_v8  ;;  %1860 = vpow2.f32 %v1175_v48  ;;  %v1088_v48 = vsub.f32 %v2354_v4, %v2494_v27 }
 0x30c   : >> { %v1841_v10 = vpop.eup %1840  ;;  %1305 = vmatprep.subr.mxu1 %v1839_v16  ;;  %1862 = vpow2.f32 %v1179_v50 }
 0x30d   : >> { %v1252_v62 = vadd.f32 %v2616_v36, %v1251_v22  ;;  %v1274_v9 = vadd.f32 %v1837_v40, %v1273_v46  ;;  %v1843_v63 = vpop.eup %1842  ;;  %1306 = vmatpush1.msra.mxu1 %v2554_v53  ;;  %v1086_v46 = vsub.f32 %v2346_v60, %v2494_v27 }
 0x30e   : >> { %v1845_v22 = vpop.eup %1844  ;;  %1307 = vmatprep.subr.mxu1 %v1843_v63 }
 0x30f   : >> { %v1253_v35 = vadd.f32 %v2624_v55, %v1252_v62  ;;  %v1275_v6 = vadd.f32 %v1841_v10, %v1274_v9  ;;  %v1847_v8 = vpop.eup %1846  ;;  %1308 = vmatpush1.msra.mxu1 %v2550_v39  ;;  %v1183_v62 = vmul.f32 1.442695, %v1078_v24  ;;  %v1199_v4 = vmul.f32 1.442695, %v1086_v46 }
 0x310   : >> { %1309 = vmatprep.subr.mxu1 %v1847_v8  ;;  %v2671_v53 = vpop.eup %1848 }
 0x311   : >> { %v1254_v32 = vadd.f32 %v2630_v51, %v1253_v35  ;;  %v1276_v52 = vadd.f32 %v1845_v22, %v1275_v6  ;;  %1310 = vmatpush1.msra.mxu1 %v2545_v28  ;;  %v2677_v39 = vpop.eup %1850  ;;  %v1100_v6 = vsub.f32 %v2429_v26, %v2494_v27  ;;  %1864 = vpow2.f32 %v1183_v62 }
 0x312   : >> { %1311 = vmatprep.subr.mxu1 %v1845_v22  ;;  %v1191_v28 = vmul.f32 1.442695, %v1082_v12  ;;  %v2685_v35 = vpop.eup %1852  ;;  %1866 = vpow2.f32 %v1187_v44  ;;  %v1195_v26 = vmul.f32 1.442695, %v1084_v18 }
 0x313   : >> { %v1255_v42 = vadd.f32 %v2638_v30, %v1254_v32  ;;  %v1277_v54 = vadd.f32 %v1847_v8, %v1276_v52  ;;  %1312 = vmatpush1.msra.mxu1 %v2541_v21  ;;  %v2693_v22 = vpop.eup %1854 }
 0x314   : >> { %1313 = vmatprep.subr.mxu1 %v1841_v10  ;;  %v1090_v10 = vsub.f32 %v2362_v1, %v2494_v27  ;;  %1868 = vpow2.f32 %v1191_v28  ;;  %v1092_v1 = vsub.f32 %v2370_v25, %v2494_v27 }
 0x315   : >> { %v1256_v9 = vadd.f32 %v2671_v53, %v1255_v42  ;;  %v1278_v24 = vadd.f32 %v1843_v63, %v1277_v54  ;;  %1314 = vmatpush1.msra.mxu1 %v2534_v3  ;;  %v1096_v63 = vsub.f32 %v2391_v47, %v2494_v27  ;;  %v1227_v3 = vmul.f32 1.442695, %v1100_v6 }
 0x316   : >> { %1315 = vmatprep.subr.mxu1 %v1837_v40  ;;  %v2705_v40 = vpop.eup %1856  ;;  %v1094_v47 = vsub.f32 %v2378_v33, %v2494_v27  ;;  %1870 = vpow2.f32 %v1195_v26  ;;  %v1211_v33 = vmul.f32 1.442695, %v1092_v1 }
 0x317   : >> { %v1257_v56 = vadd.f32 %v2677_v39, %v1256_v9  ;;  %v1279_v21 = vadd.f32 %v1839_v16, %v1278_v24  ;;  %1316 = vmatpush1.msra.mxu1 %v2527_v13  ;;  %v1203_v16 = vmul.f32 1.442695, %v1088_v48  ;;  %v1223_v13 = vmul.f32 1.442695, %v1098_v31 }
 0x318   : >> { %1317 = vmatprep.subr.mxu1 %v2648_v38  ;;  %1872 = vpow2.f32 %v1199_v4  ;;  %v1207_v38 = vmul.f32 1.442695, %v1090_v10  ;;  %v1219_v8 = vmul.f32 1.442695, %v1096_v63  ;;  %v1215_v27 = vmul.f32 1.442695, %v1094_v47 }
 0x319   : >> { %v1258_v60 = vadd.f32 %v2685_v35, %v1257_v56  ;;  %v1280_v32 = vadd.f32 %v2652_v49, %v1279_v21  ;;  %1318 = vmatpush1.msra.mxu1 %v2520_v58  ;;  %v2714_v49 = vpop.eup %1858  ;;  %1874 = vpow2.f32 %v1227_v3  ;;  %v2930_v47 = vmov (%p515_p11), 0.0  }
 0x31a   : >> { %1319 = vmatprep.subr.mxu1 %v2644_v11  ;;  %v2719_v58 = vpop.eup %1860  ;;  %1876 = vpow2.f32 %v1203_v16  ;;  %1494 = vmatprep.mubr.f32.mxu0 (%p515_p11), %v2930_v47 }
 0x31b   : >> { %v2701_v20 = vadd.f32 %v2693_v22, %v1258_v60  ;;  %v1281_v50 = vadd.f32 %v2705_v40, %v1280_v32  ;;  %1320 = vmatpush1.msra.mxu1 %v2513_v37  ;;  %1878 = vpow2.f32 %v1223_v13  ;;  %v2724_v12 = vpop.eup %1862 }
 0x31c   : >> { %1321 = vmatprep.subr.mxu1 %v2636_v7  ;;  %1880 = vpow2.f32 %v1207_v38 }
 0x31d   : >> { %v1282_v25 = vadd.f32 %v2714_v49, %v1281_v50  ;;  %1322 = vmatpush1.msra.mxu1 %v2506_v2  ;;  %1882 = vpow2.f32 %v1219_v8 }
 0x31e   : >> { %1323 = vmatprep.subr.mxu1 %v2628_v19  ;;  %v1865_v7 = vpop.eup %1864  ;;  %1884 = vpow2.f32 %v1211_v33  ;;  %v1396_v33 = vld [vmem:[%s2862_s4 + $0x10] sm:$0xff] (%p515_p11) }
 0x31f   : >> { %v1283_v11 = vadd.f32 %v2719_v58, %v1282_v25  ;;  %1324 = vmatpush1.msra.mxu1 %v2499_v43  ;;  %1886 = vpow2.f32 %v1215_v27  ;;  %v1867_v42 = vpop.eup %1866  ;;  %v1382_v25 = vld [vmem:[%s2861_s3] sm:$0xff] (%p515_p11) }
 0x320   : >> { %1325 = vmatprep.subr.mxu1 %v2620_v34  ;;  %v1394_v27 = vld [vmem:[%s2862_s4] sm:$0xff] (%p515_p11) }
 0x321   : >> { %v1284_v37 = vadd.f32 %v2724_v12, %v1283_v11  ;;  %1326 = vmatpush1.msra.mxu1 %v2490_v23  ;;  %v1869_v43 = vpop.eup %1868  ;;  %v1383_v11 = vld [vmem:[%s2861_s3 + $0x8] sm:$0xff] (%p515_p11) }
 0x322   : >> { %1327 = vmatprep.subr.mxu1 %v2612_v41 }
 0x323   : >> { %v1285_v2 = vadd.f32 %v1865_v7, %v1284_v37  ;;  %1328 = vmatpush1.msra.mxu1 %v2483_v5  ;;  %v1871_v34 = vpop.eup %1870  ;;  %v2931_v37 = vmov (%p515_p11), 0  }
 0x324   : >> { %1329 = vmatprep.subr.mxu1 %v2604_v61  ;;  %1893 = vset.pattern.permute.xlu1 (%p515_p11), %v2931_v37 }
 0x325   : >> { %v1286_v19 = vadd.f32 %v1867_v42, %v1285_v2  ;;  %1330 = vmatpush1.msra.mxu1 %v2476_v15  ;;  %v1873_v23 = vpop.eup %1872  ;;  %1892 = vset.pattern.permute.xlu0 (%p515_p11), %v2931_v37  ;;  %v1395_v2 = vld [vmem:[%s2862_s4 + $0x8] sm:$0xff] (%p515_p11) }
 0x326   : >> { %1331 = vmatprep.subr.mxu1 %v2595_v45  ;;  %v1875_v41 = vpop.eup %1874  ;;  %1410 = vperm.xlu1 (%p515_p11), %1893, %v1396_v33  }
 0x327   : >> { %v1287_v62 = vadd.f32 %v1869_v43, %v1286_v19  ;;  %1332 = vmatpush1.msra.mxu1 %v2468_v59  ;;  %v1877_v5 = vpop.eup %1876  ;;  %1400 = vperm.xlu0 (%p515_p11), %1892, %v1394_v27  }
 0x328   : >> { %1333 = vmatprep.subr.mxu1 %v2590_v17  ;;  %v1879_v61 = vpop.eup %1878 }
 0x329   : >> { %v1288_v52 = vadd.f32 %v1871_v34, %v1287_v62  ;;  %1334 = vmatpush1.msra.mxu1 %v2464_v14  ;;  %v1881_v15 = vpop.eup %1880 }
 0x32a   : >> { %1335 = vmatprep.subr.mxu1 %v1875_v41  ;;  %v1883_v45 = vpop.eup %1882 }
 0x32b   : >> { %v1289_v18 = vadd.f32 %v1873_v23, %v1288_v52  ;;  %1336 = vmatpush2.msra.mxu1 %v2693_v22  ;;  %v1885_v59 = vpop.eup %1884  ;;  %1405 = vperm.xlu0 (%p515_p11), %1892, %v1395_v2  }
 0x32c   : >> { %1337 = vmatprep.subr.mxu1 %v1879_v61  ;;  %v1887_v54 = vpop.eup %1886 }
 0x32d   : >> { %v1290_v9 = vadd.f32 %v1877_v5, %v1289_v18  ;;  %1338 = vmatpush2.msra.mxu1 %v2685_v35 }
 0x32e   : >> { %1339 = vmatprep.subr.mxu1 %v1883_v45 }
 0x32f   : >> { %v1291_v44 = vadd.f32 %v1881_v15, %v1290_v9  ;;  %1340 = vmatpush2.msra.mxu1 %v2677_v39 }
 0x330   : >> { %1341 = vmatprep.subr.mxu1 %v1887_v54 }
 0x331   : >> { %v1292_v17 = vadd.f32 %v1885_v59, %v1291_v44  ;;  %1342 = vmatpush2.msra.mxu1 %v2671_v53 }
 0x332   : >> { %1343 = vmatprep.subr.mxu1 %v1885_v59 }
 0x333   : >> { %v1293_v14 = vadd.f32 %v1887_v54, %v1292_v17  ;;  %1344 = vmatpush2.msra.mxu1 %v2638_v30  ;;  %v2927_v30 = vld [vmem:[#allocation16_spill] sm:$0xff] }
 0x334   : >> { %1345 = vmatprep.subr.mxu1 %v1881_v15 }
 0x335   : >> { %v1294_v46 = vadd.f32 %v1883_v45, %v1293_v14  ;;  %1346 = vmatpush2.msra.mxu1 %v2630_v51  ;;  %v2925_v51 = vld [vmem:[#allocation18_spill] sm:$0xff] }
 0x336   : >> { %1347 = vmatprep.subr.mxu1 %v1877_v5 }
 0x337   : >> { %v1295_v6 = vadd.f32 %v1879_v61, %v1294_v46  ;;  %1348 = vmatpush2.msra.mxu1 %v2624_v55  ;;  %v2926_v55 = vld [vmem:[#allocation17_spill] sm:$0xff] }
 0x338   : >> { %1349 = vmatprep.subr.mxu1 %v1873_v23 }
 0x339   : >> { %v1296_v56 = vadd.f32 %v1875_v41, %v1295_v6  ;;  %1350 = vmatpush2.msra.mxu1 %v2616_v36  ;;  %v543_v36 = vld [vmem:[%s2459_s16] sm:$0xff] }
 0x33a   : >> { %1351 = vmatprep.subr.mxu1 %v1871_v34 }
 0x33b   : >> { %1352 = vmatpush2.msra.mxu1 %v2608_v29  ;;  %v2928_v29 = vld [vmem:[#allocation15_spill] sm:$0xff]  ;;  %v1297_v53 = vrot.slane %v1296_v56, 4 }
 0x33c   : >> { %1353 = vmatprep.subr.mxu1 %v1869_v43 }
 0x33d   : >> { %1354 = vmatpush2.msra.mxu1 %v2599_v57  ;;  %v2929_v57 = vld [vmem:[#allocation12_spill] sm:$0xff]  ;;  %v1298_v28 = vadd.f32 %v1297_v53, %v1296_v56 }
 0x33e   : >> { %1355 = vmatprep.subr.mxu1 %v1867_v42 }
 0x33f   : >> { %1356 = vmatpush2.msra.mxu1 %v2586_v0  ;;  %v1260_v0 = vrot.slane %v2701_v20, 4  ;;  %v1299_v35 = vrot.slane %v1298_v28, 2 }
 0x340   : >> { %1357 = vmatprep.subr.mxu1 %v1865_v7  ;;  %v1397_v7 = vld [vmem:[%s2862_s4 + $0x18] sm:$0xff] (%p515_p11) }
 0x341   : >> { %1358 = vmatpush2.msra.mxu1 %v2925_v51  ;;  %v1261_v39 = vadd.f32 %v1260_v0, %v2701_v20  ;;  %v1300_v31 = vadd.f32 %v1299_v35, %v1298_v28  ;;  %1415 = vperm.xlu1 (%p515_p11), %1893, %v1397_v7  }
 0x342   : >> { %1359 = vmatprep.subr.mxu1 %v2724_v12  ;;  %v1385_v12 = vld [vmem:[%s2861_s3 + $0x18] sm:$0xff] (%p515_p11) }
 0x343   : >> { %1360 = vmatpush2.msra.mxu1 %v2926_v55  ;;  %v1262_v24 = vrot.slane %v1261_v39, 2  ;;  %v1301_v26 = vrot.slane %v1300_v31, 1 }
 0x344   : >> { %1361 = vmatprep.subr.mxu1 %v2719_v58  ;;  %v1384_v58 = vld [vmem:[%s2861_s3 + $0x10] sm:$0xff] (%p515_p11) }
 0x345   : >> { %1362 = vmatpush2.msra.mxu1 %v2927_v30  ;;  %v1263_v48 = vadd.f32 %v1262_v24, %v1261_v39  ;;  %v1302_v22 = vadd.f32 %v1301_v26, %v1300_v31 }
 0x346   : >> { %1363 = vmatprep.subr.mxu1 %v2714_v49 }
 0x347   : >> { %1364 = vmatpush2.msra.mxu1 %v2928_v29  ;;  %v1264_v60 = vrot.slane %v1263_v48, 1 }
 0x348   : >> { %1365 = vmatprep.subr.mxu1 %v2705_v40 }
 0x349   : >> { %1366 = vmatpush2.msra.mxu1 %v2929_v57  ;;  %v1265_v21 = vadd.f32 %v1264_v60, %v1263_v48 }
 0x34a   : >> { %1368 = vmatmul.mubr.f32.vlgmr.msra.gmra.mxu1 %v543_v36 }
 0x34b   : >> { %1888 = vrcp.f32 %v1265_v21  ;;  %1506 = vmatprep.mubr.f32.mxu1 (%p515_p11), %v2930_v47 }
 0x34c   : >> { %1890 = vrcp.f32 %v1302_v22 }
 0x358   : >> { %v1889_v10 = vpop.eup %1888 }
 0x359   : >> { %v1891_v3 = vpop.eup %1890 }
 0x3a1   : > { %v1411_v42 = vpop.permute.xlu1 (%p515_p11), %1410 }
 0x3a2   : > { %v1401_v19 = vpop.permute.xlu0 (%p515_p11), %1400 }
 0x3a6   : > { %v1406_v18 = vpop.permute.xlu0 (%p515_p11), %1405 }
 0x3bc   : > { %v1416_v5 = vpop.permute.xlu1 (%p515_p11), %1415 }
 0x40a   : >> { %v1369_v63 = vpop.f32.mrf.mxu1 }
 0x40b   : >> { %v1376_v4 = vmul.f32 %v1889_v10, %v1369_v63  ;;  %517 = sbr.rel (!%p515_p11) target bundleno = 250 (0xfa), region = 86 }
 0x40c   : >> { %v1371_v32 = vpop.f32.mrf.mxu1 }
 0x40d   : >> { %1380 = vst [vmem:[%s1379_s17] sm:$0xff] %v1376_v4  ;;  %v1377_v20 = vmul.f32 %v1891_v3, %v1371_v32 }
 0x40f   : >> { %1381 = vst [vmem:[%s1379_s17 + $0x8] sm:$0xff] %v1377_v20 }
 0x416   : > { %v1393_v40 = vld [vmem:[#allocation3 + $0x38] sm:$0xff]  ;;  %v1392_v1 = vld [vmem:[#allocation3 + $0x30] sm:$0xff]  ;;  %v1391_v16 = vld [vmem:[#allocation3 + $0x28] sm:$0xff] }
 0x417   : > { %1454 = vmatprep.subr.mxu0 %v1393_v40  ;;  %1698 = vmatprep.subr.mxu1 %v1393_v40  ;;  %v1390_v13 = vld [vmem:[#allocation3 + $0x20] sm:$0xff]  ;;  %v1389_v50 = vld [vmem:[#allocation3 + $0x18] sm:$0xff]  ;;  %v1388_v49 = vld [vmem:[#allocation3 + $0x10] sm:$0xff] }
 0x418   : > { %1455 = vmatpush1.msra.mxu0 %v1392_v1  ;;  %1702 = vmatpush1.msra.mxu1 %v1392_v1  ;;  %v1387_v38 = vld [vmem:[#allocation3 + $0x8] sm:$0xff]  ;;  %v1386_v8 = vld [vmem:[#allocation3] sm:$0xff] }
 0x419   : > { %1456 = vmatprep.subr.mxu0 %v1391_v16  ;;  %1699 = vmatprep.subr.mxu1 %v1391_v16 }
 0x41a   : > { %1457 = vmatpush1.msra.mxu0 %v1390_v13  ;;  %1703 = vmatpush1.msra.mxu1 %v1390_v13 }
 0x41b   : > { %1458 = vmatprep.subr.mxu0 %v1389_v50  ;;  %1700 = vmatprep.subr.mxu1 %v1389_v50 }
 0x41c   : > { %1459 = vmatpush1.msra.mxu0 %v1388_v49  ;;  %1704 = vmatpush1.msra.mxu1 %v1388_v49 }
 0x41d   : > { %1460 = vmatprep.subr.mxu0 %v1387_v38  ;;  %1701 = vmatprep.subr.mxu1 %v1387_v38 }
 0x41e   : > { %1461 = vmatpush1.msra.mxu0 %v1386_v8  ;;  %1705 = vmatpush1.msra.mxu1 %v1386_v8 }
 0x41f   : > { %1675 = vmatmul.mubr.msk.f32.vlgmr.msra.gmra.mxu0 %vm315_vm0, %v1382_v25  ;;  %1677 = vmatmul.mubr.msk.f32.vlgmr.msra.gmra.mxu1 %vm315_vm0, %v1384_v58 }
 0x420   : > { %1500 = vmatprep.mubr.f32.mxu0 %v2930_v47  ;;  %1512 = vmatprep.mubr.f32.mxu1 %v2930_v47 }
 0x423   : > { %1676 = vmatmul.mubr.msk.f32.gmra.mxu0 %vm315_vm0, %v1383_v11  ;;  %1678 = vmatmul.mubr.msk.f32.gmra.mxu1 %vm315_vm0, %v1385_v12 }
 0x4df   : > { %v1496_v43 = vpop.f32.mrf.mxu0  ;;  %v1508_v62 = vpop.f32.mrf.mxu1 }
 0x4e0   : > { %v1497_v34 = vadd.f32 %v1496_v43, %v1401_v19  ;;  %v1509_v23 = vadd.f32 %v1508_v62, %v1411_v42 }
 0x4e1   : > { %v1498_v52 = vpop.f32.mrf.mxu0  ;;  %v1510_v41 = vpop.f32.mrf.mxu1 }
 0x4e2   : > { %1519 = vst [vmem:[%s2165_s23] sm:$0xff] %v1497_v34  ;;  %1523 = vst [vmem:[%s2165_s23 + $0x20] sm:$0xff] %v1509_v23  ;;  %v1499_v61 = vadd.f32 %v1498_v52, %v1401_v19  ;;  %v1511_v15 = vadd.f32 %v1510_v41, %v1411_v42 }
 0x4e3   : > { %v1502_v9 = vpop.f32.mrf.mxu0  ;;  %v1514_v45 = vpop.f32.mrf.mxu1 }
 0x4e4   : > { %1520 = vst [vmem:[%s2165_s23 + $0x8] sm:$0xff] %v1499_v61  ;;  %1524 = vst [vmem:[%s2165_s23 + $0x28] sm:$0xff] %v1511_v15  ;;  %v1503_v59 = vadd.f32 %v1502_v9, %v1406_v18  ;;  %v1515_v44 = vadd.f32 %v1514_v45, %v1416_v5 }
 0x4e5   : > { %v1504_v54 = vpop.f32.mrf.mxu0  ;;  %v1516_v17 = vpop.f32.mrf.mxu1 }
 0x4e6   : > { %1521 = vst [vmem:[%s2165_s23 + $0x10] sm:$0xff] %v1503_v59  ;;  %1525 = vst [vmem:[%s2165_s23 + $0x30] sm:$0xff] %v1515_v44  ;;  %v1505_v14 = vadd.f32 %v1504_v54, %v1406_v18  ;;  %v1517_v46 = vadd.f32 %v1516_v17, %v1416_v5 }
 0x4e8   : > { %1522 = vst [vmem:[%s2165_s23 + $0x18] sm:$0xff] %v1505_v14  ;;  %1526 = vst [vmem:[%s2165_s23 + $0x38] sm:$0xff] %v1517_v46 }
 0x4e9   : > { %1907 = shalt.err (!%p1904_p4)
}
 0x4ea   : > { %s1908_s30 = scalar_lea.hbm %s2808_s10, 1024  ;;  %s1912_s16 = scalar_lea.hbm %s2863_s5, 2048 }
 0x4eb   : > { %p1909_p7 = scmp.ne.s32.totalorder %s2808_s10, %s1908_s30  ;;  %p1913_p10 = scmp.lt.s32.totalorder %s2808_s10, %s2863_s5 }
 0x4ec   : > { %p1914_p11 = scmp.lt.s32.totalorder %s1912_s16, %s1908_s30 }
 0x4ed   : > { %p1910_p8 = pnand %p1909_p7, %p2038_p5 }
 0x4ee   : > { %p1915_p12 = por %p1914_p11, %p1913_p10 }
 0x4ef   : > { %p1911_p9 = pneg %p1910_p8 }
 0x4f1   : > { %p1916_p13 = pnand %p1915_p12, %p1911_p9 }
 0x4f3   : > { %1919 = shalt.err (!%p1916_p13)
}
 0x4f4   : > { %s1968_s26 = smov 256   ;;  %s1969_s7 = smov 16  }
 0x4f5   : > { %1706 = dma.vmem_to_hbm [thread:$0]  (%p2038_p5), %s2810_s8, 1024, %s2808_s10, %s2818_s22, %s1968_s26, %s1968_s26, %s1969_s7  }
 0x4f6 PF: > { %p1712_p0 = scmp.ge.s32.totalorder %s1958_s21, 2  ;;  %s1556_s9 = sand.u32 1, %s1946_s18  }
 0x4f7   : > { %s1557_s6 = scalar_lea.sflag [#allocation5], %s1556_s9 }
 0x4f8   : > { %p1709_p1 = pnand %p1712_p0, %p2042_p6 }
 0x4fa   : > { %p1710_p2 = pneg %p1709_p1 }
 0x4fc   : > { %1941 = dma.done.wait (%p1710_p2), %s1557_s6, 1024  }
 0x4fd   : > { %1943 = vsyncadd (%p1710_p2), %s1557_s6, 4294966272  ;;  %p15_p3 = scmp.ge.s32.totalorder %s2025_s24, 4   ;;  %s2932_s18 = smov %s1950_s19 }
 0x4fe   : > { %s2933_s19 = smov %s1954_s20  ;;  %s2934_s20 = smov %s2036_s27 }
 0x4ff   : > { %s2935_s21 = smov %s2025_s24  ;;  %17 = sbr.rel (!%p15_p3) target bundleno = 3 (0x3), region = 97 }
 0x504   :  { %1562 = vsyncpa [#allocation5], 1 }
 0x505   :  { %1564 = vsyncpa [#allocation5 + $0x1], 1 }

</bundles_post_ra>
